<compile_context>
chip_gen: v5e
topology: v5e:2x2
jax: 0.10.0
libtpu: 0.0.40
codegen_flags: <defaults>
</compile_context>

<pallas_src>
import functools

import jax
import jax.numpy as jnp
import numpy as np
from jax.experimental import pallas as pl
from jax.experimental.pallas import tpu as pltpu

C_IN = 3
C_OUT = 64
KW = 9            # conv1 kernel (1, 9), padding (1, 0)
POOL_KW = 5       # maxpool kernel (1, 5), stride 1, padding (1, 2)
CPAD = 8          # 3 input channels zero-padded to 8
BN_EPS = 1e-5
VMEM_LIMIT = 32 * 1024 * 1024   # working set is budgeted well below this


def _pick_row_tile(nh, w, wout):
    """Largest multiple-of-8 row tile (<=512) whose per-tile working set fits a VMEM budget."""
    l = wout * C_OUT
    per_row = (w * CPAD * 2) * 2          # bf16 input, double-buffered
    per_row += (l * 2) * 2                # bf16 output, double-buffered
    per_row += (wout + 4) * C_OUT * 4     # f32 pool scratch
    per_row += l * 4 * 3                  # f32 acc / affine / pooled temps
    budget = 16 << 20
    cap = max(8, (budget // max(per_row, 1)) // 8 * 8)
    tr = min(512, cap)
    tr = min(tr, -(-nh // 8) * 8)         # never exceed the (8-padded) problem size
    return max(8, tr)


# ---------------- pass 1: per-tile BN partial statistics of the raw conv ----------------
def _stats_kernel(x_ref, w_ref, sum_ref, sq_ref, *, l):
    acc = jnp.dot(x_ref[...], w_ref[...], preferred_element_type=jnp.float32)  # (TR, L) f32
    n8 = acc.shape[0] // 8
    sum_ref[...] = jnp.sum(acc.reshape(n8, 8, l), axis=0)[None]                # (1, 8, L)
    sq_ref[...] = jnp.sum((acc * acc).reshape(n8, 8, l), axis=0)[None]


# ---------------- pass 2: conv + affine (BN + bias) + width maxpool ----------------
def _apply_kernel(x_ref, w_ref, scale_ref, shift_ref, out_ref, pool_ref, *, wout):
    l = wout * C_OUT
    tr = x_ref.shape[0]
    acc = jnp.dot(x_ref[...], w_ref[...], preferred_element_type=jnp.float32)  # (TR, L) f32
    t = acc * scale_ref[...] + shift_ref[...]                                  # BN(conv)+bias

    # MaxPool (1,5), stride 1, width pad 2, -inf implicit padding, in the flat
    # (wo, c) lane layout: write t into an -inf-bordered scratch, then take 5
    # statically shifted lane windows (shift granularity = C_OUT lanes).
    pad = (POOL_KW // 2) * C_OUT                        # 128 lanes each side
    pool_ref[:, :pad] = jnp.full((tr, pad), -jnp.inf, jnp.float32)
    pool_ref[:, pad + l:2 * pad + l] = jnp.full((tr, pad), -jnp.inf, jnp.float32)
    pool_ref[:, pad:pad + l] = t
    pooled = pool_ref[:, 0:l]
    for s in range(1, POOL_KW):
        pooled = jnp.maximum(pooled, pool_ref[:, s * C_OUT:s * C_OUT + l])

    out_ref[...] = pooled.astype(out_ref.dtype)          # lane-dense bf16 store


def init_params(key):
    k1, k2, k3, k4 = jax.random.split(key, 4)
    return {
        "w1": jax.random.normal(k1, (C_OUT, C_IN, 1, KW), jnp.float32) * 0.1,
        "b1": jax.random.normal(k2, (C_OUT,), jnp.float32) * 0.1,
        "gamma": jnp.ones((C_OUT,), jnp.float32),     # PyTorch BatchNorm2d defaults
        "beta": jnp.zeros((C_OUT,), jnp.float32),
        "w2": jax.random.normal(k3, (C_OUT, C_IN, 1, 1), jnp.float32) * 0.1,
        "b2": jax.random.normal(k4, (C_OUT,), jnp.float32) * 0.1,
    }


@jax.jit
def model_forward(x, params):
    N, C, H, W = x.shape
    Wout = W - KW + 1
    L = Wout * C_OUT
    NH = N * H
    TR = _pick_row_tile(NH, W, Wout)
    T = -(-NH // TR)
    NH_pad = T * TR
    K = W * CPAD

    # --- layout plumbing (single pass over x): NCHW -> lane-dense (NH_pad, W*8) bf16 ---
    x_rows = jnp.transpose(x, (0, 2, 3, 1)).reshape(NH, W, C)
    x_rows = jnp.pad(x_rows, ((0, NH_pad - NH), (0, 0), (0, CPAD - C)))
    x_rows = x_rows.reshape(NH_pad, K).astype(jnp.bfloat16)

    # --- banded conv weight: x_rows @ bigw is the whole (bias-free) 1x9 valid conv ---
    wk = jnp.pad(jnp.transpose(params["w1"].reshape(C_OUT, C, KW), (2, 1, 0)),
                 ((0, 0), (0, CPAD - C), (0, 0)))                    # (KW, 8, 64) f32
    bigw = jnp.zeros((W, CPAD, Wout, C_OUT), jnp.float32)
    for wo in range(Wout):
        bigw = bigw.at[wo:wo + KW, :, wo, :].set(wk)
    bigw = bigw.reshape(K, L).astype(jnp.bfloat16)                   # (W*8, Wout*64)

    conv_flops = 2 * NH_pad * K * L
    x_bytes = x_rows.size * 2
    w_bytes = bigw.size * 2

    # ---------------- pass 1: conv statistics (parallel grid, per-tile partials) ----------------
    stats_kernel = functools.partial(_stats_kernel, l=L)
    part_sum, part_sq = pl.pallas_call(
        stats_kernel,
        grid=(T,),
        in_specs=[pl.BlockSpec((TR, K), lambda i: (i, 0)),
                  pl.BlockSpec((K, L), lambda i: (0, 0))],
        out_specs=(pl.BlockSpec((1, 8, L), lambda i: (i, 0, 0)),
                   pl.BlockSpec((1, 8, L), lambda i: (i, 0, 0))),
        out_shape=(jax.ShapeDtypeStruct((T, 8, L), jnp.float32),
                   jax.ShapeDtypeStruct((T, 8, L), jnp.float32)),
        compiler_params=pltpu.CompilerParams(
            dimension_semantics=("parallel",), vmem_limit_bytes=VMEM_LIMIT),
        cost_estimate=pl.CostEstimate(
            flops=conv_flops, transcendentals=0,
            bytes_accessed=x_bytes + w_bytes + 2 * T * 8 * L * 4),
    )(x_rows, bigw)

    s1 = jnp.sum(part_sum.reshape(T * 8, Wout, C_OUT), axis=(0, 1))   # raw conv sum  (64,)
    s2 = jnp.sum(part_sq.reshape(T * 8, Wout, C_OUT), axis=(0, 1))    # raw conv sumsq (64,)

    # --- BN math (training-mode biased stats; conv height-pad rows equal the bias b1) ---
    # TODO(synk): E[x^2]-E[x]^2 in f32 can cancel for very large N*H*Wout; fine at this scale.
    b1, gamma, beta = params["b1"], params["gamma"], params["beta"]
    M_real = NH * Wout
    n_hpad = 2 * N * Wout
    total = float(M_real + n_hpad)
    sum_t1 = s1 + total * b1
    sq_t1 = s2 + 2.0 * b1 * s1 + total * b1 * b1
    mean = sum_t1 / total
    var = jnp.maximum(sq_t1 / total - mean * mean, 0.0)
    scale = gamma * jax.lax.rsqrt(var + BN_EPS)
    base_shift = beta + (b1 - mean) * scale              # BN(conv) = conv_raw*scale + base_shift
    scale_lanes = jnp.tile(scale, Wout).reshape(1, L).astype(jnp.float32)
    shift_lanes = jnp.tile(base_shift, Wout).reshape(1, L).astype(jnp.float32)

    # --- t5 branch: adaptive avg pool + 1x1 conv (tiny; added after the pool, which commutes) ---
    t4 = jnp.mean(x, axis=(2, 3))                                       # (N, 3)
    t5 = t4 @ params["w2"].reshape(C_OUT, C).T + params["b2"]           # (N, 64)

    # ---------------- pass 2: conv + affine + maxpool, lane-dense bf16 store ----------------
    apply_kernel = functools.partial(_apply_kernel, wout=Wout)
    main2d = pl.pallas_call(
        apply_kernel,
        grid=(T,),
        in_specs=[pl.BlockSpec((TR, K), lambda i: (i, 0)),
                  pl.BlockSpec((K, L), lambda i: (0, 0)),
                  pl.BlockSpec((1, L), lambda i: (0, 0)),
                  pl.BlockSpec((1, L), lambda i: (0, 0))],
        out_specs=pl.BlockSpec((TR, L), lambda i: (i, 0)),
        out_shape=jax.ShapeDtypeStruct((NH_pad, L), jnp.bfloat16),
        scratch_shapes=[pltpu.VMEM((TR, (Wout + 4) * C_OUT), jnp.float32)],
        compiler_params=pltpu.CompilerParams(
            dimension_semantics=("parallel",), vmem_limit_bytes=VMEM_LIMIT),
        cost_estimate=pl.CostEstimate(
            flops=conv_flops + NH_pad * L * (2 + POOL_KW), transcendentals=0,
            bytes_accessed=x_bytes + w_bytes + 2 * L * 4 + NH_pad * L * 2),
    )(x_rows, bigw, scale_lanes, shift_lanes)

    # --- assemble NCHW: add t5, analytic border rows, transpose (layout plumbing) ---
    main = main2d[:NH].astype(jnp.float32).reshape(N, H, Wout, C_OUT)
    main = jnp.transpose(main, (0, 3, 1, 2)) + t5[:, :, None, None]     # (N, 64, H, Wout)
    band = jnp.broadcast_to((base_shift[None, :] + t5)[:, :, None, None],
                            (N, C_OUT, 1, Wout))                        # conv height-pad rows
    ninf = jnp.full((N, C_OUT, 1, Wout), -jnp.inf, jnp.float32)         # pool height-pad rows
    return jnp.concatenate([ninf, band, main, band, ninf], axis=2)


def reference_forward(x, params):
    """Pure-JAX reference of the PyTorch forward (training-mode BN, -inf maxpool pad)."""
    t1 = jax.lax.conv_general_dilated(
        x, params["w1"], window_strides=(1, 1), padding=((1, 1), (0, 0)),
        dimension_numbers=("NCHW", "OIHW", "NCHW")) + params["b1"][None, :, None, None]
    mean = jnp.mean(t1, axis=(0, 2, 3), keepdims=True)
    var = jnp.mean((t1 - mean) ** 2, axis=(0, 2, 3), keepdims=True)
    t2 = ((t1 - mean) * jax.lax.rsqrt(var + BN_EPS)
          * params["gamma"][None, :, None, None] + params["beta"][None, :, None, None])
    t3 = jax.lax.reduce_window(
        t2, -jnp.inf, jax.lax.max,
        window_dimensions=(1, 1, 1, POOL_KW), window_strides=(1, 1, 1, 1),
        padding=((0, 0), (0, 0), (1, 1), (2, 2)))
    t4 = jnp.mean(x, axis=(2, 3))
    t5 = t4 @ params["w2"].reshape(C_OUT, C_IN).T + params["b2"]
    return t3 + t5[:, :, None, None]


if __name__ == "__main__":
    key = jax.random.PRNGKey(0)
    kx, kp = jax.random.split(key)
    # TODO(synk): the original fuzz input (1,3,1024,7) is invalid for a width-9 conv
    # (W < 9) and PyTorch's MaxPool2d rejects padding > kernel_size//2 on the height
    # axis; we use a valid small shape and natural -inf-padded maxpool semantics for
    # the over-padded height dimension (rows 0 and -1 of the output are -inf).
    x = jax.random.normal(kx, (2, 3, 64, 16), jnp.float32)
    params = init_params(kp)

    out = jax.block_until_ready(model_forward(x, params))
    ref = reference_forward(x, params)

    N, _, H, W = x.shape
    assert out.shape == (N, C_OUT, H + 4, W - KW + 1), out.shape
    # structural check: pool-height padding rows are -inf
    assert np.all(np.isneginf(np.asarray(out[:, :, 0, :])))
    assert np.all(np.isneginf(np.asarray(out[:, :, -1, :])))
    # numerical check (loose tolerance: conv runs in bf16 on the MXU, bf16 output store)
    assert np.allclose(np.asarray(out), np.asarray(ref), rtol=2e-2, atol=1e-1)

    print("KERNEL_OK")
</pallas_src>

<mosaic_0001>
module attributes {stable_mosaic.version = 11 : i64} {
  func.func @_stats_kernel(%arg0: i32, %arg1: memref<128x128xbf16, #tpu.memory_space<vmem>>, %arg2: memref<128x512xbf16, #tpu.memory_space<vmem>>, %arg3: memref<1x8x512xf32, #tpu.memory_space<vmem>>, %arg4: memref<1x8x512xf32, #tpu.memory_space<vmem>>) attributes {dimension_semantics = [#tpu.dimension_semantics<parallel>], iteration_bounds = array<i64: 1>, scalar_prefetch = 0 : i64, scratch_operands = 0 : i64, tpu.core_type = #tpu.core_type<tc>, window_params = [{transform_indices = @transform_0, window_bounds = array<i64: 128, 128>}, {pipeline_mode = #tpu.pipeline_mode<synchronous>, transform_indices = @transform_1, window_bounds = array<i64: 128, 512>}, {transform_indices = @transform_2, window_bounds = array<i64: 1, 8, 512>}, {transform_indices = @transform_3, window_bounds = array<i64: 1, 8, 512>}]} {
    %c0 = arith.constant 0 : index
    %c0_0 = arith.constant 0 : index
    %0 = vector.load %arg1[%c0, %c0_0] : memref<128x128xbf16, #tpu.memory_space<vmem>>, vector<128x128xbf16>
    %c0_1 = arith.constant 0 : index
    %c0_2 = arith.constant 0 : index
    %1 = vector.load %arg2[%c0_1, %c0_2] : memref<128x512xbf16, #tpu.memory_space<vmem>>, vector<128x512xbf16>
    %cst = arith.constant dense<0.000000e+00> : vector<128x512xf32>
    %2 = tpu.matmul %0, %1, %cst {dimension_numbers = #tpu.dot_dimension_numbers<[1], [0], [0], [1], [0, 0, 1, 1], [], []>} : vector<128x128xbf16>, vector<128x512xbf16>, vector<128x512xf32> -> vector<128x512xf32>
    %3 = vector.shape_cast %2 : vector<128x512xf32> to vector<16x8x512xf32>
    %cst_3 = arith.constant dense<0.000000e+00> : vector<8x512xf32>
    %4 = vector.multi_reduction <add>, %3, %cst_3 [0] : vector<16x8x512xf32> to vector<8x512xf32>
    %5 = vector.shape_cast %4 : vector<8x512xf32> to vector<1x8x512xf32>
    %c0_4 = arith.constant 0 : index
    %c0_5 = arith.constant 0 : index
    %c0_6 = arith.constant 0 : index
    %6 = vector.load %arg3[%c0_4, %c0_5, %c0_6] : memref<1x8x512xf32, #tpu.memory_space<vmem>>, vector<1x8x512xf32>
    tpu.vector_store %arg3[%c0_4, %c0_5, %c0_6], %5 {strides = array<i32>} : memref<1x8x512xf32, #tpu.memory_space<vmem>>, vector<1x8x512xf32>,
    %7 = arith.mulf %2, %2 : vector<128x512xf32>
    %8 = vector.shape_cast %7 : vector<128x512xf32> to vector<16x8x512xf32>
    %cst_7 = arith.constant dense<0.000000e+00> : vector<8x512xf32>
    %9 = vector.multi_reduction <add>, %8, %cst_7 [0] : vector<16x8x512xf32> to vector<8x512xf32>
    %10 = vector.shape_cast %9 : vector<8x512xf32> to vector<1x8x512xf32>
    %c0_8 = arith.constant 0 : index
    %c0_9 = arith.constant 0 : index
    %c0_10 = arith.constant 0 : index
    %11 = vector.load %arg4[%c0_8, %c0_9, %c0_10] : memref<1x8x512xf32, #tpu.memory_space<vmem>>, vector<1x8x512xf32>
    tpu.vector_store %arg4[%c0_8, %c0_9, %c0_10], %10 {strides = array<i32>} : memref<1x8x512xf32, #tpu.memory_space<vmem>>, vector<1x8x512xf32>,
    return
  }
  func.func @transform_0(%arg0: i32) -> (i32, i32) {
    %c0_i32 = arith.constant 0 : i32
    %c0_i32_0 = arith.constant 0 : i32
    return %arg0, %c0_i32 : i32, i32
  }
  func.func @transform_1(%arg0: i32) -> (i32, i32) {
    %c0_i32 = arith.constant 0 : i32
    %c0_i32_0 = arith.constant 0 : i32
    %c0_i32_1 = arith.constant 0 : i32
    return %c0_i32, %c0_i32_0 : i32, i32
  }
  func.func @transform_2(%arg0: i32) -> (i32, i32, i32) {
    %c0_i32 = arith.constant 0 : i32
    %c0_i32_0 = arith.constant 0 : i32
    %c0_i32_1 = arith.constant 0 : i32
    return %arg0, %c0_i32, %c0_i32_0 : i32, i32, i32
  }
  func.func @transform_3(%arg0: i32) -> (i32, i32, i32) {
    %c0_i32 = arith.constant 0 : i32
    %c0_i32_0 = arith.constant 0 : i32
    %c0_i32_1 = arith.constant 0 : i32
    return %arg0, %c0_i32, %c0_i32_0 : i32, i32, i32
  }
}

module attributes {stable_mosaic.version = 11 : i64} {
  func.func @_apply_kernel(%arg0: i32, %arg1: memref<128x128xbf16, #tpu.memory_space<vmem>>, %arg2: memref<128x512xbf16, #tpu.memory_space<vmem>>, %arg3: memref<1x512xf32, #tpu.memory_space<vmem>>, %arg4: memref<1x512xf32, #tpu.memory_space<vmem>>, %arg5: memref<128x512xbf16, #tpu.memory_space<vmem>>, %arg6: memref<128x768xf32, #tpu.memory_space<vmem>>) attributes {dimension_semantics = [#tpu.dimension_semantics<parallel>], iteration_bounds = array<i64: 1>, scalar_prefetch = 0 : i64, scratch_operands = 1 : i64, tpu.core_type = #tpu.core_type<tc>, window_params = [{transform_indices = @transform_0, window_bounds = array<i64: 128, 128>}, {pipeline_mode = #tpu.pipeline_mode<synchronous>, transform_indices = @transform_1, window_bounds = array<i64: 128, 512>}, {pipeline_mode = #tpu.pipeline_mode<synchronous>, transform_indices = @transform_2, window_bounds = array<i64: 1, 512>}, {pipeline_mode = #tpu.pipeline_mode<synchronous>, transform_indices = @transform_3, window_bounds = array<i64: 1, 512>}, {transform_indices = @transform_4, window_bounds = array<i64: 128, 512>}]} {
    %c0 = arith.constant 0 : index
    %c0_0 = arith.constant 0 : index
    %0 = vector.load %arg1[%c0, %c0_0] : memref<128x128xbf16, #tpu.memory_space<vmem>>, vector<128x128xbf16>
    %c0_1 = arith.constant 0 : index
    %c0_2 = arith.constant 0 : index
    %1 = vector.load %arg2[%c0_1, %c0_2] : memref<128x512xbf16, #tpu.memory_space<vmem>>, vector<128x512xbf16>
    %cst = arith.constant dense<0.000000e+00> : vector<128x512xf32>
    %2 = tpu.matmul %0, %1, %cst {dimension_numbers = #tpu.dot_dimension_numbers<[1], [0], [0], [1], [0, 0, 1, 1], [], []>} : vector<128x128xbf16>, vector<128x512xbf16>, vector<128x512xf32> -> vector<128x512xf32>
    %c0_3 = arith.constant 0 : index
    %c0_4 = arith.constant 0 : index
    %3 = vector.load %arg3[%c0_3, %c0_4] : memref<1x512xf32, #tpu.memory_space<vmem>>, vector<1x512xf32>
    %4 = vector.broadcast %3 : vector<1x512xf32> to vector<128x512xf32>
    %5 = arith.mulf %2, %4 : vector<128x512xf32>
    %c0_5 = arith.constant 0 : index
    %c0_6 = arith.constant 0 : index
    %6 = vector.load %arg4[%c0_5, %c0_6] : memref<1x512xf32, #tpu.memory_space<vmem>>, vector<1x512xf32>
    %7 = vector.broadcast %6 : vector<1x512xf32> to vector<128x512xf32>
    %8 = arith.addf %5, %7 : vector<128x512xf32>
    %cst_7 = arith.constant 0xFF800000 : f32
    %9 = vector.broadcast %cst_7 : f32 to vector<128x128xf32>
    %c0_8 = arith.constant 0 : index
    %c0_9 = arith.constant 0 : index
    %10 = vector.load %arg6[%c0_8, %c0_9] : memref<128x768xf32, #tpu.memory_space<vmem>>, vector<128x128xf32>
    tpu.vector_store %arg6[%c0_8, %c0_9], %9 {strides = array<i32>} : memref<128x768xf32, #tpu.memory_space<vmem>>, vector<128x128xf32>,
    %cst_10 = arith.constant 0xFF800000 : f32
    %11 = vector.broadcast %cst_10 : f32 to vector<128x128xf32>
    %c0_11 = arith.constant 0 : index
    %c640 = arith.constant 640 : index
    %12 = vector.load %arg6[%c0_11, %c640] : memref<128x768xf32, #tpu.memory_space<vmem>>, vector<128x128xf32>
    tpu.vector_store %arg6[%c0_11, %c640], %11 {strides = array<i32>} : memref<128x768xf32, #tpu.memory_space<vmem>>, vector<128x128xf32>,
    %c0_12 = arith.constant 0 : index
    %c128 = arith.constant 128 : index
    %13 = vector.load %arg6[%c0_12, %c128] : memref<128x768xf32, #tpu.memory_space<vmem>>, vector<128x512xf32>
    tpu.vector_store %arg6[%c0_12, %c128], %8 {strides = array<i32>} : memref<128x768xf32, #tpu.memory_space<vmem>>, vector<128x512xf32>,
    %c0_13 = arith.constant 0 : index
    %c0_14 = arith.constant 0 : index
    %14 = vector.load %arg6[%c0_13, %c0_14] : memref<128x768xf32, #tpu.memory_space<vmem>>, vector<128x512xf32>
    %c0_15 = arith.constant 0 : index
    %c64 = arith.constant 64 : index
    %15 = vector.load %arg6[%c0_15, %c64] : memref<128x768xf32, #tpu.memory_space<vmem>>, vector<128x512xf32>
    %16 = arith.maximumf %14, %15 : vector<128x512xf32>
    %c0_16 = arith.constant 0 : index
    %c128_17 = arith.constant 128 : index
    %17 = vector.load %arg6[%c0_16, %c128_17] : memref<128x768xf32, #tpu.memory_space<vmem>>, vector<128x512xf32>
    %18 = arith.maximumf %16, %17 : vector<128x512xf32>
    %c0_18 = arith.constant 0 : index
    %c192 = arith.constant 192 : index
    %19 = vector.load %arg6[%c0_18, %c192] : memref<128x768xf32, #tpu.memory_space<vmem>>, vector<128x512xf32>
    %20 = arith.maximumf %18, %19 : vector<128x512xf32>
    %c0_19 = arith.constant 0 : index
    %c256 = arith.constant 256 : index
    %21 = vector.load %arg6[%c0_19, %c256] : memref<128x768xf32, #tpu.memory_space<vmem>>, vector<128x512xf32>
    %22 = arith.maximumf %20, %21 : vector<128x512xf32>
    %23 = arith.truncf %22 : vector<128x512xf32> to vector<128x512xbf16>
    %c0_20 = arith.constant 0 : index
    %c0_21 = arith.constant 0 : index
    %24 = vector.load %arg5[%c0_20, %c0_21] : memref<128x512xbf16, #tpu.memory_space<vmem>>, vector<128x512xbf16>
    tpu.vector_store %arg5[%c0_20, %c0_21], %23 {strides = array<i32>} : memref<128x512xbf16, #tpu.memory_space<vmem>>, vector<128x512xbf16>,
    return
  }
  func.func @transform_0(%arg0: i32) -> (i32, i32) {
    %c0_i32 = arith.constant 0 : i32
    %c0_i32_0 = arith.constant 0 : i32
    return %arg0, %c0_i32 : i32, i32
  }
  func.func @transform_1(%arg0: i32) -> (i32, i32) {
    %c0_i32 = arith.constant 0 : i32
    %c0_i32_0 = arith.constant 0 : i32
    %c0_i32_1 = arith.constant 0 : i32
    return %c0_i32, %c0_i32_0 : i32, i32
  }
  func.func @transform_2(%arg0: i32) -> (i32, i32) {
    %c0_i32 = arith.constant 0 : i32
    %c0_i32_0 = arith.constant 0 : i32
    %c0_i32_1 = arith.constant 0 : i32
    return %c0_i32, %c0_i32_0 : i32, i32
  }
  func.func @transform_3(%arg0: i32) -> (i32, i32) {
    %c0_i32 = arith.constant 0 : i32
    %c0_i32_0 = arith.constant 0 : i32
    %c0_i32_1 = arith.constant 0 : i32
    return %c0_i32, %c0_i32_0 : i32, i32
  }
  func.func @transform_4(%arg0: i32) -> (i32, i32) {
    %c0_i32 = arith.constant 0 : i32
    %c0_i32_0 = arith.constant 0 : i32
    return %arg0, %c0_i32 : i32, i32
  }
}

</mosaic_0001>

<bundles_post_ra>
// kernel: tile.18
= control target key start
LH: loop header
LB: loop body
LE: loop exit
PB: predicated region body
PF: predicated region fallthrough
CT: control target
= control target key end

     0   :  { %s22_s0 = inlined_call_operand.vmem [shape: f32[64], index: 0, kind: input, shape index: {}]   ;;  %s23_s1 = inlined_call_operand.vmem [shape: f32[8,64], index: 1, kind: output, shape index: {}]  }
   0x1   :  { %v4_v0 = vld [vmem:[%s22_s0] ss:$0 sm:$0xff] }
   0x2   :  { %5 = vst [vmem:[%s23_s1] sm:$0xff] %v4_v0 }

// kernel: tile.19
= control target key start
LH: loop header
LB: loop body
LE: loop exit
PB: predicated region body
PF: predicated region fallthrough
CT: control target
= control target key end

     0   :  { %vm3_vm0 = vcmask 523264   ;;  %s40_s8 = smov 64   ;;  %vm9_vm1 = vcmask 1048064   ;;  %s69_s0 = inlined_call_operand.vmem [shape: f32[8,64], index: 0, kind: input, shape index: {}]   ;;  %s70_s1 = inlined_call_operand.vmem [shape: f32[1,512], index: 1, kind: output, shape index: {}]  }
   0x1   :  { %v35_v0 = vld [vmem:[%s69_s0 + $0x1] ss:$2 sm:$0xf]   ;;  %v2_v1 = vld [vmem:[%s69_s0] ss:$2 sm:$0xf]  }
   0x2   :  { %7 = vrot.lane.b32.xlu0 %v35_v0, %s40_s8  ;;  %4 = vst.msk [vmem:[#allocation0] ss:$8 sm:$0xf] %vm3_vm0, %v2_v1  }
  0x74   :  { %v8_v2 = vpop.permute.xlu0 %7  }
  0x75   :  { %10 = vst.msk [vmem:[#allocation0] ss:$8 sm:$0xf] %vm9_vm1, %v8_v2  }
  0x7c   :  { %v13_v3 = vld [vmem:[#allocation0] sm:$0x1]  ;;  %v18_v4 = vld [vmem:[#allocation0 + $0x8] sm:$0x1]  ;;  %v24_v5 = vld [vmem:[#allocation0 + $0x10] sm:$0x1] }
  0x7d   :  { %16 = vst [vmem:[%s70_s1] sm:$0x1] %v13_v3  ;;  %v30_v6 = vld [vmem:[#allocation0 + $0x18] sm:$0x1] }
  0x7e   :  { %36 = vst [vmem:[%s70_s1 + $0x1] sm:$0x1] %v18_v4 }
  0x7f   :  { %37 = vst [vmem:[%s70_s1 + $0x2] sm:$0x1] %v24_v5 }
  0x80   :  { %38 = vst [vmem:[%s70_s1 + $0x3] sm:$0x1] %v30_v6 }

// kernel: model_forward.2
= control target key start
LH: loop header
LB: loop body
LE: loop exit
PB: predicated region body
PF: predicated region fallthrough
CT: control target
= control target key end

     0   :  { %s1220_s1 = inlined_call_operand.vmem [shape: bf16[128,512], index: 1, kind: input, shape index: {}]   ;;  %s1221_s0 = inlined_call_operand.vmem [shape: bf16[128,128], index: 0, kind: input, shape index: {}]   ;;  %s1222_s2 = inlined_call_operand.vmem [shape: f32[1,8,512], index: 2, kind: output, shape index: {0}]   ;;  %s1223_s3 = inlined_call_operand.vmem [shape: f32[1,8,512], index: 3, kind: output, shape index: {1}]  }
   0x1   :  { %v811_v0 = vld [vmem:[%s1220_s1 + $0xe0] sm:$0xf]  ;;  %v863_v1 = vld [vmem:[%s1220_s1 + $0xec] sm:$0xf0]  ;;  %v861_v2 = vld [vmem:[%s1220_s1 + $0xe4] sm:$0xf] }
   0x2   :  { %v812_v3 = vor.u32 %v863_v1, %v811_v0  ;;  %v813_v4 = vld [vmem:[%s1220_s1 + $0xf0] sm:$0xf0]  ;;  %v819_v5 = vld [vmem:[%s1220_s1 + $0xe8] sm:$0xf]  ;;  %v864_v6 = vld [vmem:[%s1220_s1 + $0xf4] sm:$0xf0] }
   0x3   :  { %v816_v7 = vor.u32 %v861_v2, %v813_v4  ;;  %v820_v8 = vor.u32 %v864_v6, %v819_v5  ;;  %v862_v9 = vld [vmem:[%s1220_s1 + $0xec] sm:$0xf]  ;;  %v821_v10 = vld [vmem:[%s1220_s1 + $0xf8] sm:$0xf0]  ;;  %v795_v11 = vld [vmem:[%s1220_s1 + $0xc0] sm:$0xf] }
   0x4   :  { %269 = vmatpush.bf16.msra.mxu0 %v812_v3  ;;  %v824_v12 = vor.u32 %v862_v9, %v821_v10  ;;  %v859_v13 = vld [vmem:[%s1220_s1 + $0xcc] sm:$0xf0]  ;;  %v857_v14 = vld [vmem:[%s1220_s1 + $0xc4] sm:$0xf]  ;;  %v797_v15 = vld [vmem:[%s1220_s1 + $0xd0] sm:$0xf0] }
   0x5   :  { %318 = vmatpush.bf16.msra.mxu1 %v816_v7  ;;  %367 = vmatpush.bf16.msra.mxu2 %v820_v8  ;;  %v796_v16 = vor.u32 %v859_v13, %v795_v11  ;;  %v800_v17 = vor.u32 %v857_v14, %v797_v15  ;;  %v803_v18 = vld [vmem:[%s1220_s1 + $0xc8] sm:$0xf]  ;;  %v860_v19 = vld [vmem:[%s1220_s1 + $0xd4] sm:$0xf0]  ;;  %v858_v20 = vld [vmem:[%s1220_s1 + $0xcc] sm:$0xf] }
   0x6   :  { %416 = vmatpush.bf16.msra.mxu3 %v824_v12  ;;  %v804_v21 = vor.u32 %v860_v19, %v803_v18  ;;  %v805_v22 = vld [vmem:[%s1220_s1 + $0xd8] sm:$0xf0]  ;;  %v779_v23 = vld [vmem:[%s1220_s1 + $0xa0] sm:$0xf]  ;;  %v855_v24 = vld [vmem:[%s1220_s1 + $0xac] sm:$0xf0] }
   0x7   :  { %v808_v25 = vor.u32 %v858_v20, %v805_v22  ;;  %v853_v26 = vld [vmem:[%s1220_s1 + $0xa4] sm:$0xf]  ;;  %v781_v27 = vld [vmem:[%s1220_s1 + $0xb0] sm:$0xf0]  ;;  %v787_v28 = vld [vmem:[%s1220_s1 + $0xa8] sm:$0xf]  ;;  %v780_v29 = vor.u32 %v855_v24, %v779_v23 }
   0x8   :  { %270 = vmatpush.bf16.msra.mxu0 %v796_v16  ;;  %v856_v30 = vld [vmem:[%s1220_s1 + $0xb4] sm:$0xf0]  ;;  %v854_v31 = vld [vmem:[%s1220_s1 + $0xac] sm:$0xf]  ;;  %v789_v32 = vld [vmem:[%s1220_s1 + $0xb8] sm:$0xf0]  ;;  %v784_v33 = vor.u32 %v853_v26, %v781_v27 }
   0x9   :  { %319 = vmatpush.bf16.msra.mxu1 %v800_v17  ;;  %368 = vmatpush.bf16.msra.mxu2 %v804_v21  ;;  %v788_v34 = vor.u32 %v856_v30, %v787_v28  ;;  %v763_v35 = vld [vmem:[%s1220_s1 + $0x80] sm:$0xf]  ;;  %v851_v36 = vld [vmem:[%s1220_s1 + $0x8c] sm:$0xf0]  ;;  %v849_v37 = vld [vmem:[%s1220_s1 + $0x84] sm:$0xf]  ;;  %v792_v38 = vor.u32 %v854_v31, %v789_v32 }
   0xa   :  { %417 = vmatpush.bf16.msra.mxu3 %v808_v25  ;;  %v765_v39 = vld [vmem:[%s1220_s1 + $0x90] sm:$0xf0]  ;;  %v771_v40 = vld [vmem:[%s1220_s1 + $0x88] sm:$0xf]  ;;  %v852_v41 = vld [vmem:[%s1220_s1 + $0x94] sm:$0xf0]  ;;  %v764_v44 = vor.u32 %v851_v36, %v763_v35 }
   0xb   :  { %v850_v42 = vld [vmem:[%s1220_s1 + $0x8c] sm:$0xf]  ;;  %v773_v43 = vld [vmem:[%s1220_s1 + $0x98] sm:$0xf0]  ;;  %v768_v45 = vor.u32 %v849_v37, %v765_v39  ;;  %v772_v46 = vor.u32 %v852_v41, %v771_v40  ;;  %v747_v47 = vld [vmem:[%s1220_s1 + $0x60] sm:$0xf] }
   0xc   :  { %271 = vmatpush.bf16.msra.mxu0 %v780_v29  ;;  %v847_v48 = vld [vmem:[%s1220_s1 + $0x6c] sm:$0xf0]  ;;  %v845_v49 = vld [vmem:[%s1220_s1 + $0x64] sm:$0xf]  ;;  %v776_v50 = vor.u32 %v850_v42, %v773_v43  ;;  %v749_v51 = vld [vmem:[%s1220_s1 + $0x70] sm:$0xf0] }
   0xd   :  { %320 = vmatpush.bf16.msra.mxu1 %v784_v33  ;;  %369 = vmatpush.bf16.msra.mxu2 %v788_v34  ;;  %v755_v52 = vld [vmem:[%s1220_s1 + $0x68] sm:$0xf]  ;;  %v848_v53 = vld [vmem:[%s1220_s1 + $0x74] sm:$0xf0]  ;;  %v846_v54 = vld [vmem:[%s1220_s1 + $0x6c] sm:$0xf]  ;;  %v748_v56 = vor.u32 %v847_v48, %v747_v47  ;;  %v752_v57 = vor.u32 %v845_v49, %v749_v51 }
   0xe   :  { %418 = vmatpush.bf16.msra.mxu3 %v792_v38  ;;  %v757_v55 = vld [vmem:[%s1220_s1 + $0x78] sm:$0xf0]  ;;  %v756_v58 = vor.u32 %v848_v53, %v755_v52  ;;  %v731_v59 = vld [vmem:[%s1220_s1 + $0x40] sm:$0xf]  ;;  %v843_v60 = vld [vmem:[%s1220_s1 + $0x4c] sm:$0xf0] }
   0xf   :  { %v841_v61 = vld [vmem:[%s1220_s1 + $0x44] sm:$0xf]  ;;  %v760_v62 = vor.u32 %v846_v54, %v757_v55  ;;  %v733_v63 = vld [vmem:[%s1220_s1 + $0x50] sm:$0xf0]  ;;  %v739_v0 = vld [vmem:[%s1220_s1 + $0x48] sm:$0xf]  ;;  %v732_v4 = vor.u32 %v843_v60, %v731_v59 }
  0x10   :  { %272 = vmatpush.bf16.msra.mxu0 %v764_v44  ;;  %v844_v1 = vld [vmem:[%s1220_s1 + $0x54] sm:$0xf0]  ;;  %v842_v2 = vld [vmem:[%s1220_s1 + $0x4c] sm:$0xf]  ;;  %v741_v3 = vld [vmem:[%s1220_s1 + $0x58] sm:$0xf0]  ;;  %v736_v5 = vor.u32 %v841_v61, %v733_v63 }
  0x11   :  { %321 = vmatpush.bf16.msra.mxu1 %v768_v45  ;;  %370 = vmatpush.bf16.msra.mxu2 %v772_v46  ;;  %v740_v6 = vor.u32 %v844_v1, %v739_v0  ;;  %v715_v7 = vld [vmem:[%s1220_s1 + $0x20] sm:$0xf]  ;;  %v839_v8 = vld [vmem:[%s1220_s1 + $0x2c] sm:$0xf0]  ;;  %v837_v9 = vld [vmem:[%s1220_s1 + $0x24] sm:$0xf]  ;;  %v744_v10 = vor.u32 %v842_v2, %v741_v3 }
  0x12   :  { %419 = vmatpush.bf16.msra.mxu3 %v776_v50  ;;  %v717_v11 = vld [vmem:[%s1220_s1 + $0x30] sm:$0xf0]  ;;  %v723_v12 = vld [vmem:[%s1220_s1 + $0x28] sm:$0xf]  ;;  %v840_v13 = vld [vmem:[%s1220_s1 + $0x34] sm:$0xf0]  ;;  %v716_v16 = vor.u32 %v839_v8, %v715_v7 }
  0x13   :  { %v838_v14 = vld [vmem:[%s1220_s1 + $0x2c] sm:$0xf]  ;;  %v725_v15 = vld [vmem:[%s1220_s1 + $0x38] sm:$0xf0]  ;;  %v720_v17 = vor.u32 %v837_v9, %v717_v11  ;;  %v724_v18 = vor.u32 %v840_v13, %v723_v12  ;;  %v699_v19 = vld [vmem:[%s1220_s1] sm:$0xf] }
  0x14   :  { %273 = vmatpush.bf16.msra.mxu0 %v748_v56  ;;  %v835_v20 = vld [vmem:[%s1220_s1 + $0xc] sm:$0xf0]  ;;  %v833_v21 = vld [vmem:[%s1220_s1 + $0x4] sm:$0xf]  ;;  %v728_v22 = vor.u32 %v838_v14, %v725_v15  ;;  %v701_v23 = vld [vmem:[%s1220_s1 + $0x10] sm:$0xf0] }
  0x15   :  { %322 = vmatpush.bf16.msra.mxu1 %v752_v57  ;;  %371 = vmatpush.bf16.msra.mxu2 %v756_v58  ;;  %v707_v24 = vld [vmem:[%s1220_s1 + $0x8] sm:$0xf]  ;;  %v836_v25 = vld [vmem:[%s1220_s1 + $0x14] sm:$0xf0]  ;;  %v834_v26 = vld [vmem:[%s1220_s1 + $0xc] sm:$0xf]  ;;  %v700_v28 = vor.u32 %v835_v20, %v699_v19  ;;  %v704_v29 = vor.u32 %v833_v21, %v701_v23 }
  0x16   :  { %420 = vmatpush.bf16.msra.mxu3 %v760_v62  ;;  %v709_v27 = vld [vmem:[%s1220_s1 + $0x18] sm:$0xf0]  ;;  %v708_v30 = vor.u32 %v836_v25, %v707_v24  ;;  %v825_v32 = vld [vmem:[%s1221_s0] sm:$0xff]  ;;  %v826_v33 = vld [vmem:[%s1221_s0 + $0x8] sm:$0xff] }
  0x17   :  { %v712_v31 = vor.u32 %v834_v26, %v709_v27  ;;  %v827_v34 = vld [vmem:[%s1221_s0 + $0x10] sm:$0xff]  ;;  %v828_v35 = vld [vmem:[%s1221_s0 + $0x18] sm:$0xff]  ;;  %v829_v36 = vld [vmem:[%s1221_s0 + $0x20] sm:$0xff] }
  0x18   :  { %274 = vmatpush.bf16.msra.mxu0 %v732_v4  ;;  %v830_v37 = vld [vmem:[%s1221_s0 + $0x28] sm:$0xff]  ;;  %v831_v38 = vld [vmem:[%s1221_s0 + $0x30] sm:$0xff]  ;;  %v832_v39 = vld [vmem:[%s1221_s0 + $0x38] sm:$0xff] }
  0x19   :  { %323 = vmatpush.bf16.msra.mxu1 %v736_v5  ;;  %372 = vmatpush.bf16.msra.mxu2 %v740_v6 }
  0x1a   :  { %421 = vmatpush.bf16.msra.mxu3 %v744_v10 }
  0x1c   :  { %275 = vmatpush.bf16.msra.mxu0 %v716_v16 }
  0x1d   :  { %324 = vmatpush.bf16.msra.mxu1 %v720_v17  ;;  %373 = vmatpush.bf16.msra.mxu2 %v724_v18 }
  0x1e   :  { %422 = vmatpush.bf16.msra.mxu3 %v728_v22 }
  0x20   :  { %276 = vmatpush.bf16.msra.mxu0 %v700_v28 }
  0x21   :  { %325 = vmatpush.bf16.msra.mxu1 %v704_v29  ;;  %374 = vmatpush.bf16.msra.mxu2 %v708_v30 }
  0x22   :  { %423 = vmatpush.bf16.msra.mxu3 %v712_v31 }
  0x23   :  { %277 = vmatmul.bf16.vlgmr.msra.gmra.mxu0 %v825_v32 }
  0x24   :  { %326 = vmatmul.bf16.vlgmr.msra.gmra.mxu1 %v825_v32  ;;  %375 = vmatmul.bf16.vlgmr.msra.gmra.mxu2 %v825_v32 }
  0x25   :  { %424 = vmatmul.bf16.vlgmr.msra.gmra.mxu3 %v825_v32 }
  0x33   :  { %282 = vmatmul.bf16.gmra.mxu0 %v826_v33 }
  0x34   :  { %331 = vmatmul.bf16.gmra.mxu1 %v826_v33  ;;  %380 = vmatmul.bf16.gmra.mxu2 %v826_v33 }
  0x35   :  { %429 = vmatmul.bf16.gmra.mxu3 %v826_v33 }
  0x43   :  { %287 = vmatmul.bf16.gmra.mxu0 %v827_v34 }
  0x44   :  { %336 = vmatmul.bf16.gmra.mxu1 %v827_v34  ;;  %385 = vmatmul.bf16.gmra.mxu2 %v827_v34 }
  0x45   :  { %434 = vmatmul.bf16.gmra.mxu3 %v827_v34 }
  0x53   :  { %292 = vmatmul.bf16.gmra.mxu0 %v828_v35 }
  0x54   :  { %341 = vmatmul.bf16.gmra.mxu1 %v828_v35  ;;  %390 = vmatmul.bf16.gmra.mxu2 %v828_v35 }
  0x55   :  { %439 = vmatmul.bf16.gmra.mxu3 %v828_v35 }
  0x63   :  { %297 = vmatmul.bf16.gmra.mxu0 %v829_v36 }
  0x64   :  { %346 = vmatmul.bf16.gmra.mxu1 %v829_v36  ;;  %395 = vmatmul.bf16.gmra.mxu2 %v829_v36 }
  0x65   :  { %444 = vmatmul.bf16.gmra.mxu3 %v829_v36 }
  0x73   :  { %302 = vmatmul.bf16.gmra.mxu0 %v830_v37 }
  0x74   :  { %351 = vmatmul.bf16.gmra.mxu1 %v830_v37  ;;  %400 = vmatmul.bf16.gmra.mxu2 %v830_v37 }
  0x75   :  { %449 = vmatmul.bf16.gmra.mxu3 %v830_v37 }
  0x83   :  { %307 = vmatmul.bf16.gmra.mxu0 %v831_v38 }
  0x84   :  { %356 = vmatmul.bf16.gmra.mxu1 %v831_v38  ;;  %405 = vmatmul.bf16.gmra.mxu2 %v831_v38 }
  0x85   :  { %454 = vmatmul.bf16.gmra.mxu3 %v831_v38 }
  0x93   :  { %312 = vmatmul.bf16.gmra.mxu0 %v832_v39 }
  0x94   :  { %361 = vmatmul.bf16.gmra.mxu1 %v832_v39  ;;  %410 = vmatmul.bf16.gmra.mxu2 %v832_v39 }
  0x95   :  { %459 = vmatmul.bf16.gmra.mxu3 %v832_v39 }
  0xa0   :  { %v278_v40 = vpop.f32.mrf.mxu0 }
  0xa1   :  { %v327_v41 = vpop.f32.mrf.mxu1  ;;  %v529_v45 = vmul.f32 %v278_v40, %v278_v40 }
  0xa2   :  { %v530_v49 = vmul.f32 %v327_v41, %v327_v41 }
  0xa7   :  { %v376_v42 = vpop.f32.mrf.mxu2 }
  0xa8   :  { %v425_v43 = vpop.f32.mrf.mxu3  ;;  %v280_v44 = vpop.f32.mrf.mxu0  ;;  %v531_v55 = vmul.f32 %v376_v42, %v376_v42 }
  0xa9   :  { %v465_v46 = vadd.f32 %v280_v44, %v278_v40  ;;  %v533_v47 = vmul.f32 %v280_v44, %v280_v44  ;;  %v329_v48 = vpop.f32.mrf.mxu1  ;;  %v532_v56 = vmul.f32 %v425_v43, %v425_v43 }
  0xaa   :  { %v480_v50 = vadd.f32 %v329_v48, %v327_v41  ;;  %v534_v51 = vmul.f32 %v329_v48, %v329_v48 }
  0xab   :  { %v593_v52 = vadd.f32 %v533_v47, %v529_v45 }
  0xac   :  { %v608_v53 = vadd.f32 %v534_v51, %v530_v49 }
  0xaf   :  { %v378_v54 = vpop.f32.mrf.mxu2 }
  0xb0   :  { %v495_v57 = vadd.f32 %v378_v54, %v376_v42  ;;  %v535_v58 = vmul.f32 %v378_v54, %v378_v54  ;;  %v427_v59 = vpop.f32.mrf.mxu3  ;;  %v283_v60 = vpop.f32.mrf.mxu0 }
  0xb1   :  { %v510_v61 = vadd.f32 %v427_v59, %v425_v43  ;;  %v536_v62 = vmul.f32 %v427_v59, %v427_v59  ;;  %v466_v63 = vadd.f32 %v465_v46, %v283_v60  ;;  %v537_v0 = vmul.f32 %v283_v60, %v283_v60  ;;  %v332_v1 = vpop.f32.mrf.mxu1 }
  0xb2   :  { %v623_v2 = vadd.f32 %v535_v58, %v531_v55  ;;  %v481_v3 = vadd.f32 %v480_v50, %v332_v1  ;;  %v538_v4 = vmul.f32 %v332_v1, %v332_v1 }
  0xb3   :  { %v638_v5 = vadd.f32 %v536_v62, %v532_v56  ;;  %v594_v6 = vadd.f32 %v593_v52, %v537_v0 }
  0xb4   :  { %v609_v7 = vadd.f32 %v608_v53, %v538_v4 }
  0xb7   :  { %v381_v8 = vpop.f32.mrf.mxu2 }
  0xb8   :  { %v496_v9 = vadd.f32 %v495_v57, %v381_v8  ;;  %v539_v10 = vmul.f32 %v381_v8, %v381_v8  ;;  %v430_v11 = vpop.f32.mrf.mxu3  ;;  %v285_v12 = vpop.f32.mrf.mxu0 }
  0xb9   :  { %v511_v13 = vadd.f32 %v510_v61, %v430_v11  ;;  %v540_v14 = vmul.f32 %v430_v11, %v430_v11  ;;  %v467_v15 = vadd.f32 %v466_v63, %v285_v12  ;;  %v541_v16 = vmul.f32 %v285_v12, %v285_v12  ;;  %v334_v17 = vpop.f32.mrf.mxu1 }
  0xba   :  { %v624_v18 = vadd.f32 %v623_v2, %v539_v10  ;;  %v482_v19 = vadd.f32 %v481_v3, %v334_v17  ;;  %v542_v20 = vmul.f32 %v334_v17, %v334_v17 }
  0xbb   :  { %v639_v21 = vadd.f32 %v638_v5, %v540_v14  ;;  %v595_v22 = vadd.f32 %v594_v6, %v541_v16 }
  0xbc   :  { %v610_v23 = vadd.f32 %v609_v7, %v542_v20 }
  0xbf   :  { %v383_v24 = vpop.f32.mrf.mxu2 }
  0xc0   :  { %v497_v25 = vadd.f32 %v496_v9, %v383_v24  ;;  %v543_v26 = vmul.f32 %v383_v24, %v383_v24  ;;  %v432_v27 = vpop.f32.mrf.mxu3  ;;  %v288_v28 = vpop.f32.mrf.mxu0 }
  0xc1   :  { %v512_v29 = vadd.f32 %v511_v13, %v432_v27  ;;  %v544_v30 = vmul.f32 %v432_v27, %v432_v27  ;;  %v468_v31 = vadd.f32 %v467_v15, %v288_v28  ;;  %v545_v32 = vmul.f32 %v288_v28, %v288_v28  ;;  %v337_v33 = vpop.f32.mrf.mxu1 }
  0xc2   :  { %v625_v34 = vadd.f32 %v624_v18, %v543_v26  ;;  %v483_v35 = vadd.f32 %v482_v19, %v337_v33  ;;  %v546_v36 = vmul.f32 %v337_v33, %v337_v33 }
  0xc3   :  { %v640_v37 = vadd.f32 %v639_v21, %v544_v30  ;;  %v596_v38 = vadd.f32 %v595_v22, %v545_v32 }
  0xc4   :  { %v611_v39 = vadd.f32 %v610_v23, %v546_v36 }
  0xc7   :  { %v386_v40 = vpop.f32.mrf.mxu2 }
  0xc8   :  { %v498_v41 = vadd.f32 %v497_v25, %v386_v40  ;;  %v547_v42 = vmul.f32 %v386_v40, %v386_v40  ;;  %v435_v43 = vpop.f32.mrf.mxu3  ;;  %v290_v44 = vpop.f32.mrf.mxu0 }
  0xc9   :  { %v513_v45 = vadd.f32 %v512_v29, %v435_v43  ;;  %v548_v46 = vmul.f32 %v435_v43, %v435_v43  ;;  %v339_v47 = vpop.f32.mrf.mxu1  ;;  %v549_v10 = vmul.f32 %v290_v44, %v290_v44  ;;  %v469_v18 = vadd.f32 %v468_v31, %v290_v44 }
  0xca   :  { %v626_v48 = vadd.f32 %v625_v34, %v547_v42  ;;  %v550_v11 = vmul.f32 %v339_v47, %v339_v47  ;;  %v484_v20 = vadd.f32 %v483_v35, %v339_v47 }
  0xcb   :  { %v641_v49 = vadd.f32 %v640_v37, %v548_v46  ;;  %v597_v19 = vadd.f32 %v596_v38, %v549_v10 }
  0xcc   :  { %v612_v23 = vadd.f32 %v611_v39, %v550_v11 }
  0xcf   :  { %v388_v50 = vpop.f32.mrf.mxu2 }
  0xd0   :  { %v437_v51 = vpop.f32.mrf.mxu3  ;;  %v293_v52 = vpop.f32.mrf.mxu0  ;;  %v551_v12 = vmul.f32 %v388_v50, %v388_v50  ;;  %v499_v24 = vadd.f32 %v498_v41, %v388_v50 }
  0xd1   :  { %v342_v53 = vpop.f32.mrf.mxu1  ;;  %v552_v14 = vmul.f32 %v437_v51, %v437_v51  ;;  %v553_v15 = vmul.f32 %v293_v52, %v293_v52  ;;  %v514_v25 = vadd.f32 %v513_v45, %v437_v51  ;;  %v470_v28 = vadd.f32 %v469_v18, %v293_v52 }
  0xd2   :  { %v554_v21 = vmul.f32 %v342_v53, %v342_v53  ;;  %v627_v27 = vadd.f32 %v626_v48, %v551_v12  ;;  %v485_v34 = vadd.f32 %v484_v20, %v342_v53 }
  0xd3   :  { %v642_v32 = vadd.f32 %v641_v49, %v552_v14  ;;  %v598_v33 = vadd.f32 %v597_v19, %v553_v15 }
  0xd4   :  { %v613_v37 = vadd.f32 %v612_v23, %v554_v21 }
  0xd7   :  { %v391_v54 = vpop.f32.mrf.mxu2 }
  0xd8   :  { %v440_v55 = vpop.f32.mrf.mxu3  ;;  %v295_v56 = vpop.f32.mrf.mxu0  ;;  %v555_v26 = vmul.f32 %v391_v54, %v391_v54  ;;  %v500_v40 = vadd.f32 %v499_v24, %v391_v54 }
  0xd9   :  { %v344_v57 = vpop.f32.mrf.mxu1  ;;  %v556_v29 = vmul.f32 %v440_v55, %v440_v55  ;;  %v557_v30 = vmul.f32 %v295_v56, %v295_v56  ;;  %v515_v31 = vadd.f32 %v514_v25, %v440_v55  ;;  %v471_v42 = vadd.f32 %v470_v28, %v295_v56 }
  0xda   :  { %v558_v36 = vmul.f32 %v344_v57, %v344_v57  ;;  %v628_v35 = vadd.f32 %v627_v27, %v555_v26  ;;  %v486_v45 = vadd.f32 %v485_v34, %v344_v57 }
  0xdb   :  { %v643_v39 = vadd.f32 %v642_v32, %v556_v29  ;;  %v599_v41 = vadd.f32 %v598_v33, %v557_v30 }
  0xdc   :  { %v614_v48 = vadd.f32 %v613_v37, %v558_v36 }
  0xdf   :  { %v393_v58 = vpop.f32.mrf.mxu2 }
  0xe0   :  { %v442_v59 = vpop.f32.mrf.mxu3  ;;  %v298_v60 = vpop.f32.mrf.mxu0  ;;  %v559_v38 = vmul.f32 %v393_v58, %v393_v58  ;;  %v501_v49 = vadd.f32 %v500_v40, %v393_v58 }
  0xe1   :  { %v1101_v61 = vpop.f32.mrf.mxu1  ;;  %v560_v43 = vmul.f32 %v442_v59, %v442_v59  ;;  %v561_v44 = vmul.f32 %v298_v60, %v298_v60  ;;  %v516_v50 = vadd.f32 %v515_v31, %v442_v59  ;;  %v472_v55 = vadd.f32 %v471_v42, %v298_v60 }
  0xe2   :  { %v562_v46 = vmul.f32 %v1101_v61, %v1101_v61  ;;  %v629_v54 = vadd.f32 %v628_v35, %v559_v38  ;;  %v487_v58 = vadd.f32 %v486_v45, %v1101_v61 }
  0xe3   :  { %v644_v11 = vadd.f32 %v643_v39, %v560_v43  ;;  %v600_v12 = vadd.f32 %v599_v41, %v561_v44 }
  0xe4   :  { %v615_v14 = vadd.f32 %v614_v48, %v562_v46 }
  0xe7   :  { %v1103_v62 = vpop.f32.mrf.mxu2 }
  0xe8   :  { %v1105_v63 = vpop.f32.mrf.mxu3  ;;  %v1107_v0 = vpop.f32.mrf.mxu0  ;;  %v563_v51 = vmul.f32 %v1103_v62, %v1103_v62  ;;  %v502_v15 = vadd.f32 %v501_v49, %v1103_v62 }
  0xe9   :  { %v1109_v1 = vpop.f32.mrf.mxu1  ;;  %v564_v56 = vmul.f32 %v1105_v63, %v1105_v63  ;;  %v565_v57 = vmul.f32 %v1107_v0, %v1107_v0  ;;  %v517_v18 = vadd.f32 %v516_v50, %v1105_v63  ;;  %v473_v20 = vadd.f32 %v472_v55, %v1107_v0 }
  0xea   :  { %v566_v59 = vmul.f32 %v1109_v1, %v1109_v1  ;;  %v630_v19 = vadd.f32 %v629_v54, %v563_v51  ;;  %v488_v25 = vadd.f32 %v487_v58, %v1109_v1 }
  0xeb   :  { %v645_v23 = vadd.f32 %v644_v11, %v564_v56  ;;  %v601_v24 = vadd.f32 %v600_v12, %v565_v57 }
  0xec   :  { %v616_v63 = vadd.f32 %v615_v14, %v566_v59 }
  0xef   :  { %v1111_v2 = vpop.f32.mrf.mxu2 }
  0xf0   :  { %v1113_v3 = vpop.f32.mrf.mxu3  ;;  %v1115_v4 = vpop.f32.mrf.mxu0  ;;  %v567_v60 = vmul.f32 %v1111_v2, %v1111_v2  ;;  %v503_v26 = vadd.f32 %v502_v15, %v1111_v2 }
  0xf1   :  { %v1117_v5 = vpop.f32.mrf.mxu1  ;;  %v568_v21 = vmul.f32 %v1113_v3, %v1113_v3  ;;  %v569_v61 = vmul.f32 %v1115_v4, %v1115_v4  ;;  %v518_v27 = vadd.f32 %v517_v18, %v1113_v3  ;;  %v474_v29 = vadd.f32 %v473_v20, %v1115_v4 }
  0xf2   :  { %v570_v62 = vmul.f32 %v1117_v5, %v1117_v5  ;;  %v631_v28 = vadd.f32 %v630_v19, %v567_v60  ;;  %v489_v30 = vadd.f32 %v488_v25, %v1117_v5 }
  0xf3   :  { %v646_v33 = vadd.f32 %v645_v23, %v568_v21  ;;  %v602_v34 = vadd.f32 %v601_v24, %v569_v61 }
  0xf4   :  { %v617_v40 = vadd.f32 %v616_v63, %v570_v62 }
  0xf7   :  { %v1119_v6 = vpop.f32.mrf.mxu2 }
  0xf8   :  { %v1121_v7 = vpop.f32.mrf.mxu3  ;;  %v1123_v8 = vpop.f32.mrf.mxu0  ;;  %v571_v0 = vmul.f32 %v1119_v6, %v1119_v6  ;;  %v504_v31 = vadd.f32 %v503_v26, %v1119_v6 }
  0xf9   :  { %v1125_v9 = vpop.f32.mrf.mxu1  ;;  %v573_v32 = vmul.f32 %v1123_v8, %v1123_v8  ;;  %v572_v36 = vmul.f32 %v1121_v7, %v1121_v7  ;;  %v475_v4 = vadd.f32 %v474_v29, %v1123_v8  ;;  %v519_v42 = vadd.f32 %v518_v27, %v1121_v7 }
  0xfa   :  { %v574_v2 = vmul.f32 %v1125_v9, %v1125_v9  ;;  %v632_v35 = vadd.f32 %v631_v28, %v571_v0  ;;  %v490_v43 = vadd.f32 %v489_v30, %v1125_v9 }
  0xfb   :  { %v603_v39 = vadd.f32 %v602_v34, %v573_v32  ;;  %v647_v8 = vadd.f32 %v646_v33, %v572_v36 }
  0xfc   :  { %v618_v46 = vadd.f32 %v617_v40, %v574_v2 }
  0xff   :  { %v1127_v13 = vpop.f32.mrf.mxu2 }
 0x100   :  { %v1129_v16 = vpop.f32.mrf.mxu3  ;;  %v1131_v17 = vpop.f32.mrf.mxu0  ;;  %v575_v41 = vmul.f32 %v1127_v13, %v1127_v13  ;;  %v505_v50 = vadd.f32 %v504_v31, %v1127_v13 }
 0x101   :  { %v1133_v22 = vpop.f32.mrf.mxu1  ;;  %v577_v5 = vmul.f32 %v1131_v17, %v1131_v17  ;;  %v476_v6 = vadd.f32 %v475_v4, %v1131_v17  ;;  %v520_v54 = vadd.f32 %v519_v42, %v1129_v16  ;;  %v576_v17 = vmul.f32 %v1129_v16, %v1129_v16 }
 0x102   :  { %v578_v44 = vmul.f32 %v1133_v22, %v1133_v22  ;;  %v491_v48 = vadd.f32 %v490_v43, %v1133_v22  ;;  %v633_v11 = vadd.f32 %v632_v35, %v575_v41 }
 0x103   :  { %v604_v7 = vadd.f32 %v603_v39, %v577_v5  ;;  %v648_v25 = vadd.f32 %v647_v8, %v576_v17 }
 0x104   :  { %v619_v55 = vadd.f32 %v618_v46, %v578_v44 }
 0x107   :  { %v1137_v47 = vpop.f32.mrf.mxu2 }
 0x108   :  { %v1141_v52 = vpop.f32.mrf.mxu3  ;;  %v310_v53 = vpop.f32.mrf.mxu0  ;;  %v506_v22 = vadd.f32 %v505_v50, %v1137_v47  ;;  %v579_v13 = vmul.f32 %v1137_v47, %v1137_v47 }
 0x109   :  { %v359_v10 = vpop.f32.mrf.mxu1  ;;  %v581_v45 = vmul.f32 %v310_v53, %v310_v53  ;;  %v477_v51 = vadd.f32 %v476_v6, %v310_v53  ;;  %v521_v62 = vadd.f32 %v520_v54, %v1141_v52 }
 0x10a   :  { %v582_v49 = vmul.f32 %v359_v10, %v359_v10  ;;  %v492_v56 = vadd.f32 %v491_v48, %v359_v10  ;;  %v580_v10 = vmul.f32 %v1141_v52, %v1141_v52  ;;  %v634_v26 = vadd.f32 %v633_v11, %v579_v13 }
 0x10b   :  { %v605_v12 = vadd.f32 %v604_v7, %v581_v45 }
 0x10c   :  { %v620_v14 = vadd.f32 %v619_v55, %v582_v49  ;;  %v649_v29 = vadd.f32 %v648_v25, %v580_v10 }
 0x10f   :  { %v408_v1 = vpop.f32.mrf.mxu2 }
 0x110   :  { %v457_v3 = vpop.f32.mrf.mxu3  ;;  %v313_v37 = vpop.f32.mrf.mxu0  ;;  %v583_v16 = vmul.f32 %v408_v1, %v408_v1  ;;  %v507_v27 = vadd.f32 %v506_v22, %v408_v1 }
 0x111   :  { %v362_v38 = vpop.f32.mrf.mxu1  ;;  %v585_v9 = vmul.f32 %v313_v37, %v313_v37  ;;  %v478_v58 = vadd.f32 %v477_v51, %v313_v37  ;;  %v584_v63 = vmul.f32 %v457_v3, %v457_v3  ;;  %v522_v30 = vadd.f32 %v521_v62, %v457_v3 }
 0x112   :  { %v586_v57 = vmul.f32 %v362_v38, %v362_v38  ;;  %v493_v53 = vadd.f32 %v492_v56, %v362_v38  ;;  %v635_v52 = vadd.f32 %v634_v26, %v583_v16 }
 0x113   :  { %v606_v60 = vadd.f32 %v605_v12, %v585_v9  ;;  %v650_v1 = vadd.f32 %v649_v29, %v584_v63 }
 0x114   :  { %v621_v61 = vadd.f32 %v620_v14, %v586_v57 }
 0x117   :  { %v411_v59 = vpop.f32.mrf.mxu2 }
 0x118   :  { %v460_v15 = vpop.f32.mrf.mxu3  ;;  %v315_v18 = vpop.f32.mrf.mxu0  ;;  %v587_v0 = vmul.f32 %v411_v59, %v411_v59  ;;  %v508_v33 = vadd.f32 %v507_v27, %v411_v59 }
 0x119   :  { %v479_v19 = vadd.f32 %v478_v58, %v315_v18  ;;  %v589_v20 = vmul.f32 %v315_v18, %v315_v18  ;;  %v364_v21 = vpop.f32.mrf.mxu1  ;;  %v588_v32 = vmul.f32 %v460_v15, %v460_v15  ;;  %v523_v34 = vadd.f32 %v522_v30, %v460_v15 }
 0x11a   :  { %v494_v23 = vadd.f32 %v493_v53, %v364_v21  ;;  %v590_v24 = vmul.f32 %v364_v21, %v364_v21  ;;  %v636_v2 = vadd.f32 %v635_v52, %v587_v0 }
 0x11b   :  { %525 = vst [vmem:[%s1222_s2] sm:$0xff] %v479_v19  ;;  %v607_v47 = vadd.f32 %v606_v60, %v589_v20  ;;  %v651_v4 = vadd.f32 %v650_v1, %v588_v32 }
 0x11c   :  { %526 = vst [vmem:[%s1222_s2 + $0x8] sm:$0xff] %v494_v23  ;;  %v622_v28 = vadd.f32 %v621_v61, %v590_v24 }
 0x11d   :  { %653 = vst [vmem:[%s1223_s3] sm:$0xff] %v607_v47 }
 0x11e   :  { %654 = vst [vmem:[%s1223_s3 + $0x8] sm:$0xff] %v622_v28 }
 0x11f   :  { %v413_v36 = vpop.f32.mrf.mxu2 }
 0x120   :  { %v509_v37 = vadd.f32 %v508_v33, %v413_v36  ;;  %v591_v40 = vmul.f32 %v413_v36, %v413_v36  ;;  %v462_v31 = vpop.f32.mrf.mxu3 }
 0x121   :  { %v524_v3 = vadd.f32 %v523_v34, %v462_v31  ;;  %v592_v5 = vmul.f32 %v462_v31, %v462_v31 }
 0x122   :  { %527 = vst [vmem:[%s1222_s2 + $0x10] sm:$0xff] %v509_v37  ;;  %v637_v38 = vadd.f32 %v636_v2, %v591_v40 }
 0x123   :  { %528 = vst [vmem:[%s1222_s2 + $0x18] sm:$0xff] %v524_v3  ;;  %v652_v35 = vadd.f32 %v651_v4, %v592_v5 }
 0x124   :  { %655 = vst [vmem:[%s1223_s3 + $0x10] sm:$0xff] %v637_v38 }
 0x125   :  { %656 = vst [vmem:[%s1223_s3 + $0x18] sm:$0xff] %v652_v35 }

// kernel: model_forward.3
= control target key start
LH: loop header
LB: loop body
LE: loop exit
PB: predicated region body
PF: predicated region fallthrough
CT: control target
= control target key end

     0   :  { %vm1033_vm0 = vcmask 523264   ;;  %s3808_s1 = inlined_call_operand.vmem [shape: bf16[128,512], index: 1, kind: input, shape index: {}]   ;;  %s3809_s0 = inlined_call_operand.vmem [shape: bf16[128,128], index: 0, kind: input, shape index: {}]   ;;  %s3810_s2 = inlined_call_operand.vmem [shape: f32[1,512], index: 2, kind: input, shape index: {}]   ;;  %s3811_s3 = inlined_call_operand.vmem [shape: f32[1,512], index: 3, kind: input, shape index: {}]   ;;  %s3812_s4 = inlined_call_operand.vmem [shape: bf16[128,512], index: 4, kind: output, shape index: {}]  }
   0x1   :  { %v2080_v0 = vld [vmem:[%s3808_s1 + $0xe0] sm:$0xf]  ;;  %v2132_v1 = vld [vmem:[%s3808_s1 + $0xec] sm:$0xf0]  ;;  %v2130_v2 = vld [vmem:[%s3808_s1 + $0xe4] sm:$0xf] }
   0x2   :  { %v2081_v3 = vor.u32 %v2132_v1, %v2080_v0  ;;  %v2082_v4 = vld [vmem:[%s3808_s1 + $0xf0] sm:$0xf0]  ;;  %v2088_v5 = vld [vmem:[%s3808_s1 + $0xe8] sm:$0xf]  ;;  %v2133_v6 = vld [vmem:[%s3808_s1 + $0xf4] sm:$0xf0] }
   0x3   :  { %v2085_v7 = vor.u32 %v2130_v2, %v2082_v4  ;;  %v2089_v8 = vor.u32 %v2133_v6, %v2088_v5  ;;  %v2131_v9 = vld [vmem:[%s3808_s1 + $0xec] sm:$0xf]  ;;  %v2090_v10 = vld [vmem:[%s3808_s1 + $0xf8] sm:$0xf0]  ;;  %v2064_v11 = vld [vmem:[%s3808_s1 + $0xc0] sm:$0xf] }
   0x4   :  { %273 = vmatpush.bf16.msra.mxu0 %v2081_v3  ;;  %v2093_v12 = vor.u32 %v2131_v9, %v2090_v10  ;;  %v2128_v13 = vld [vmem:[%s3808_s1 + $0xcc] sm:$0xf0]  ;;  %v2126_v14 = vld [vmem:[%s3808_s1 + $0xc4] sm:$0xf]  ;;  %v2066_v15 = vld [vmem:[%s3808_s1 + $0xd0] sm:$0xf0] }
   0x5   :  { %322 = vmatpush.bf16.msra.mxu1 %v2085_v7  ;;  %371 = vmatpush.bf16.msra.mxu2 %v2089_v8  ;;  %v2065_v16 = vor.u32 %v2128_v13, %v2064_v11  ;;  %v2069_v17 = vor.u32 %v2126_v14, %v2066_v15  ;;  %v2072_v18 = vld [vmem:[%s3808_s1 + $0xc8] sm:$0xf]  ;;  %v2129_v19 = vld [vmem:[%s3808_s1 + $0xd4] sm:$0xf0]  ;;  %v2127_v20 = vld [vmem:[%s3808_s1 + $0xcc] sm:$0xf] }
   0x6   :  { %420 = vmatpush.bf16.msra.mxu3 %v2093_v12  ;;  %v2073_v21 = vor.u32 %v2129_v19, %v2072_v18  ;;  %v2074_v22 = vld [vmem:[%s3808_s1 + $0xd8] sm:$0xf0]  ;;  %v2048_v23 = vld [vmem:[%s3808_s1 + $0xa0] sm:$0xf]  ;;  %v2124_v24 = vld [vmem:[%s3808_s1 + $0xac] sm:$0xf0] }
   0x7   :  { %v2077_v25 = vor.u32 %v2127_v20, %v2074_v22  ;;  %v2122_v26 = vld [vmem:[%s3808_s1 + $0xa4] sm:$0xf]  ;;  %v2050_v27 = vld [vmem:[%s3808_s1 + $0xb0] sm:$0xf0]  ;;  %v2056_v28 = vld [vmem:[%s3808_s1 + $0xa8] sm:$0xf]  ;;  %v2049_v29 = vor.u32 %v2124_v24, %v2048_v23 }
   0x8   :  { %274 = vmatpush.bf16.msra.mxu0 %v2065_v16  ;;  %v2125_v30 = vld [vmem:[%s3808_s1 + $0xb4] sm:$0xf0]  ;;  %v2123_v31 = vld [vmem:[%s3808_s1 + $0xac] sm:$0xf]  ;;  %v2058_v32 = vld [vmem:[%s3808_s1 + $0xb8] sm:$0xf0]  ;;  %v2053_v33 = vor.u32 %v2122_v26, %v2050_v27 }
   0x9   :  { %323 = vmatpush.bf16.msra.mxu1 %v2069_v17  ;;  %372 = vmatpush.bf16.msra.mxu2 %v2073_v21  ;;  %v2057_v34 = vor.u32 %v2125_v30, %v2056_v28  ;;  %v2032_v35 = vld [vmem:[%s3808_s1 + $0x80] sm:$0xf]  ;;  %v2120_v36 = vld [vmem:[%s3808_s1 + $0x8c] sm:$0xf0]  ;;  %v2118_v37 = vld [vmem:[%s3808_s1 + $0x84] sm:$0xf]  ;;  %v2061_v38 = vor.u32 %v2123_v31, %v2058_v32 }
   0xa   :  { %421 = vmatpush.bf16.msra.mxu3 %v2077_v25  ;;  %v2034_v39 = vld [vmem:[%s3808_s1 + $0x90] sm:$0xf0]  ;;  %v2040_v40 = vld [vmem:[%s3808_s1 + $0x88] sm:$0xf]  ;;  %v2121_v41 = vld [vmem:[%s3808_s1 + $0x94] sm:$0xf0]  ;;  %v2033_v44 = vor.u32 %v2120_v36, %v2032_v35 }
   0xb   :  { %v2119_v42 = vld [vmem:[%s3808_s1 + $0x8c] sm:$0xf]  ;;  %v2042_v43 = vld [vmem:[%s3808_s1 + $0x98] sm:$0xf0]  ;;  %v2037_v45 = vor.u32 %v2118_v37, %v2034_v39  ;;  %v2041_v46 = vor.u32 %v2121_v41, %v2040_v40  ;;  %v2016_v47 = vld [vmem:[%s3808_s1 + $0x60] sm:$0xf] }
   0xc   :  { %275 = vmatpush.bf16.msra.mxu0 %v2049_v29  ;;  %v2116_v48 = vld [vmem:[%s3808_s1 + $0x6c] sm:$0xf0]  ;;  %v2114_v49 = vld [vmem:[%s3808_s1 + $0x64] sm:$0xf]  ;;  %v2045_v50 = vor.u32 %v2119_v42, %v2042_v43  ;;  %v2018_v51 = vld [vmem:[%s3808_s1 + $0x70] sm:$0xf0] }
   0xd   :  { %324 = vmatpush.bf16.msra.mxu1 %v2053_v33  ;;  %373 = vmatpush.bf16.msra.mxu2 %v2057_v34  ;;  %v2024_v52 = vld [vmem:[%s3808_s1 + $0x68] sm:$0xf]  ;;  %v2117_v53 = vld [vmem:[%s3808_s1 + $0x74] sm:$0xf0]  ;;  %v2115_v54 = vld [vmem:[%s3808_s1 + $0x6c] sm:$0xf]  ;;  %v2017_v56 = vor.u32 %v2116_v48, %v2016_v47  ;;  %v2021_v57 = vor.u32 %v2114_v49, %v2018_v51 }
   0xe   :  { %422 = vmatpush.bf16.msra.mxu3 %v2061_v38  ;;  %v2026_v55 = vld [vmem:[%s3808_s1 + $0x78] sm:$0xf0]  ;;  %v2025_v58 = vor.u32 %v2117_v53, %v2024_v52  ;;  %v2000_v59 = vld [vmem:[%s3808_s1 + $0x40] sm:$0xf]  ;;  %v2112_v60 = vld [vmem:[%s3808_s1 + $0x4c] sm:$0xf0] }
   0xf   :  { %v2110_v61 = vld [vmem:[%s3808_s1 + $0x44] sm:$0xf]  ;;  %v2029_v62 = vor.u32 %v2115_v54, %v2026_v55  ;;  %v2002_v63 = vld [vmem:[%s3808_s1 + $0x50] sm:$0xf0]  ;;  %v2008_v0 = vld [vmem:[%s3808_s1 + $0x48] sm:$0xf]  ;;  %v2001_v4 = vor.u32 %v2112_v60, %v2000_v59 }
  0x10   :  { %276 = vmatpush.bf16.msra.mxu0 %v2033_v44  ;;  %v2113_v1 = vld [vmem:[%s3808_s1 + $0x54] sm:$0xf0]  ;;  %v2111_v2 = vld [vmem:[%s3808_s1 + $0x4c] sm:$0xf]  ;;  %v2010_v3 = vld [vmem:[%s3808_s1 + $0x58] sm:$0xf0]  ;;  %v2005_v5 = vor.u32 %v2110_v61, %v2002_v63 }
  0x11   :  { %325 = vmatpush.bf16.msra.mxu1 %v2037_v45  ;;  %374 = vmatpush.bf16.msra.mxu2 %v2041_v46  ;;  %v2009_v6 = vor.u32 %v2113_v1, %v2008_v0  ;;  %v1984_v7 = vld [vmem:[%s3808_s1 + $0x20] sm:$0xf]  ;;  %v2108_v8 = vld [vmem:[%s3808_s1 + $0x2c] sm:$0xf0]  ;;  %v2106_v9 = vld [vmem:[%s3808_s1 + $0x24] sm:$0xf]  ;;  %v2013_v10 = vor.u32 %v2111_v2, %v2010_v3 }
  0x12   :  { %423 = vmatpush.bf16.msra.mxu3 %v2045_v50  ;;  %v1986_v11 = vld [vmem:[%s3808_s1 + $0x30] sm:$0xf0]  ;;  %v1992_v12 = vld [vmem:[%s3808_s1 + $0x28] sm:$0xf]  ;;  %v2109_v13 = vld [vmem:[%s3808_s1 + $0x34] sm:$0xf0]  ;;  %v1985_v16 = vor.u32 %v2108_v8, %v1984_v7 }
  0x13   :  { %v2107_v14 = vld [vmem:[%s3808_s1 + $0x2c] sm:$0xf]  ;;  %v1994_v15 = vld [vmem:[%s3808_s1 + $0x38] sm:$0xf0]  ;;  %v1989_v17 = vor.u32 %v2106_v9, %v1986_v11  ;;  %v1993_v18 = vor.u32 %v2109_v13, %v1992_v12  ;;  %v1968_v19 = vld [vmem:[%s3808_s1] sm:$0xf] }
  0x14   :  { %277 = vmatpush.bf16.msra.mxu0 %v2017_v56  ;;  %v2104_v20 = vld [vmem:[%s3808_s1 + $0xc] sm:$0xf0]  ;;  %v2102_v21 = vld [vmem:[%s3808_s1 + $0x4] sm:$0xf]  ;;  %v1997_v22 = vor.u32 %v2107_v14, %v1994_v15  ;;  %v1970_v23 = vld [vmem:[%s3808_s1 + $0x10] sm:$0xf0] }
  0x15   :  { %326 = vmatpush.bf16.msra.mxu1 %v2021_v57  ;;  %375 = vmatpush.bf16.msra.mxu2 %v2025_v58  ;;  %v1976_v24 = vld [vmem:[%s3808_s1 + $0x8] sm:$0xf]  ;;  %v2105_v25 = vld [vmem:[%s3808_s1 + $0x14] sm:$0xf0]  ;;  %v2103_v26 = vld [vmem:[%s3808_s1 + $0xc] sm:$0xf]  ;;  %v1969_v28 = vor.u32 %v2104_v20, %v1968_v19  ;;  %v1973_v29 = vor.u32 %v2102_v21, %v1970_v23 }
  0x16   :  { %424 = vmatpush.bf16.msra.mxu3 %v2029_v62  ;;  %v1978_v27 = vld [vmem:[%s3808_s1 + $0x18] sm:$0xf0]  ;;  %v1977_v30 = vor.u32 %v2105_v25, %v1976_v24  ;;  %v2094_v32 = vld [vmem:[%s3809_s0] sm:$0xff]  ;;  %v2095_v33 = vld [vmem:[%s3809_s0 + $0x8] sm:$0xff]  ;;  %v3813_v53 = vmov -inf  }
  0x17   :  { %v1981_v31 = vor.u32 %v2103_v26, %v1978_v27  ;;  %v2096_v34 = vld [vmem:[%s3809_s0 + $0x10] sm:$0xff]  ;;  %v2097_v35 = vld [vmem:[%s3809_s0 + $0x18] sm:$0xff]  ;;  %v2098_v36 = vld [vmem:[%s3809_s0 + $0x20] sm:$0xff] }
  0x18   :  { %278 = vmatpush.bf16.msra.mxu0 %v2001_v4  ;;  %v2099_v37 = vld [vmem:[%s3809_s0 + $0x28] sm:$0xff]  ;;  %v2100_v38 = vld [vmem:[%s3809_s0 + $0x30] sm:$0xff]  ;;  %v469_v39 = vld [vmem:[%s3810_s2] sm:$0xf]  ;;  %s2537_s2 = smov 64  }
  0x19   :  { %327 = vmatpush.bf16.msra.mxu1 %v2005_v5  ;;  %376 = vmatpush.bf16.msra.mxu2 %v2009_v6  ;;  %v543_v40 = vld [vmem:[%s3811_s3] sm:$0xf]  ;;  %v2783_v41 = vperm.slane %v469_v39, 0  ;;  %v2785_v42 = vperm.slane %v469_v39, 1  ;;  %v2799_v51 = vperm.slane %v469_v39, 2  ;;  %v2801_v52 = vperm.slane %v469_v39, 3 }
  0x1a   :  { %425 = vmatpush.bf16.msra.mxu3 %v2013_v10  ;;  %v2787_v43 = vperm.slane %v543_v40, 0  ;;  %v2789_v45 = vperm.slane %v543_v40, 1  ;;  %v2805_v55 = vperm.slane %v543_v40, 2  ;;  %v2809_v58 = vperm.slane %v543_v40, 3  ;;  %v2101_v62 = vld [vmem:[%s3809_s0 + $0x38] sm:$0xff] }
  0x1c   :  { %279 = vmatpush.bf16.msra.mxu0 %v1985_v16 }
  0x1d   :  { %328 = vmatpush.bf16.msra.mxu1 %v1989_v17  ;;  %377 = vmatpush.bf16.msra.mxu2 %v1993_v18 }
  0x1e   :  { %426 = vmatpush.bf16.msra.mxu3 %v1997_v22 }
  0x20   :  { %280 = vmatpush.bf16.msra.mxu0 %v1969_v28 }
  0x21   :  { %329 = vmatpush.bf16.msra.mxu1 %v1973_v29  ;;  %378 = vmatpush.bf16.msra.mxu2 %v1977_v30 }
  0x22   :  { %427 = vmatpush.bf16.msra.mxu3 %v1981_v31 }
  0x23   :  { %281 = vmatmul.bf16.vlgmr.msra.gmra.mxu0 %v2094_v32 }
  0x24   :  { %330 = vmatmul.bf16.vlgmr.msra.gmra.mxu1 %v2094_v32  ;;  %379 = vmatmul.bf16.vlgmr.msra.gmra.mxu2 %v2094_v32 }
  0x25   :  { %428 = vmatmul.bf16.vlgmr.msra.gmra.mxu3 %v2094_v32 }
  0x33   :  { %286 = vmatmul.bf16.gmra.mxu0 %v2095_v33 }
  0x34   :  { %335 = vmatmul.bf16.gmra.mxu1 %v2095_v33  ;;  %384 = vmatmul.bf16.gmra.mxu2 %v2095_v33 }
  0x35   :  { %433 = vmatmul.bf16.gmra.mxu3 %v2095_v33 }
  0x43   :  { %291 = vmatmul.bf16.gmra.mxu0 %v2096_v34 }
  0x44   :  { %389 = vmatmul.bf16.gmra.mxu2 %v2096_v34  ;;  %340 = vmatmul.bf16.gmra.mxu1 %v2096_v34 }
  0x45   :  { %438 = vmatmul.bf16.gmra.mxu3 %v2096_v34 }
  0x53   :  { %296 = vmatmul.bf16.gmra.mxu0 %v2097_v35 }
  0x54   :  { %394 = vmatmul.bf16.gmra.mxu2 %v2097_v35  ;;  %345 = vmatmul.bf16.gmra.mxu1 %v2097_v35 }
  0x55   :  { %443 = vmatmul.bf16.gmra.mxu3 %v2097_v35 }
  0x63   :  { %301 = vmatmul.bf16.gmra.mxu0 %v2098_v36 }
  0x64   :  { %399 = vmatmul.bf16.gmra.mxu2 %v2098_v36  ;;  %350 = vmatmul.bf16.gmra.mxu1 %v2098_v36 }
  0x65   :  { %448 = vmatmul.bf16.gmra.mxu3 %v2098_v36 }
  0x73   :  { %306 = vmatmul.bf16.gmra.mxu0 %v2099_v37 }
  0x74   :  { %404 = vmatmul.bf16.gmra.mxu2 %v2099_v37  ;;  %355 = vmatmul.bf16.gmra.mxu1 %v2099_v37 }
  0x75   :  { %453 = vmatmul.bf16.gmra.mxu3 %v2099_v37 }
  0x83   :  { %311 = vmatmul.bf16.gmra.mxu0 %v2100_v38 }
  0x84   :  { %409 = vmatmul.bf16.gmra.mxu2 %v2100_v38  ;;  %360 = vmatmul.bf16.gmra.mxu1 %v2100_v38 }
  0x85   :  { %458 = vmatmul.bf16.gmra.mxu3 %v2100_v38 }
  0x93   :  { %316 = vmatmul.bf16.gmra.mxu0 %v2101_v62 }
  0x94   :  { %414 = vmatmul.bf16.gmra.mxu2 %v2101_v62  ;;  %365 = vmatmul.bf16.gmra.mxu1 %v2101_v62 }
  0x95   :  { %463 = vmatmul.bf16.gmra.mxu3 %v2101_v62 }
  0xa0   :  { %v282_v44 = vpop.f32.mrf.mxu0 }
  0xa1   :  { %v479_v46 = vmul.f32 %v2783_v41, %v282_v44  ;;  %v331_v47 = vpop.f32.mrf.mxu1 }
  0xa2   :  { %v480_v48 = vmul.f32 %v2785_v42, %v331_v47 }
  0xa3   :  { %v2794_v49 = vadd.f32 %v2787_v43, %v479_v46 }
  0xa4   :  { %v2797_v50 = vadd.f32 %v2789_v45, %v480_v48 }
  0xa5   :  { %v2136_v54 = vpack.i.bf16 %v2794_v49, %v3813_v53 }
  0xa6   :  { %v2141_v56 = vpack.i.bf16 %v2797_v50, %v2794_v49 }
  0xa7   :  { %v380_v57 = vpop.f32.mrf.mxu2  ;;  %2137 = vrot.lane.b32.xlu0 %v2136_v54, %s2537_s2 }
  0xa8   :  { %v481_v59 = vmul.f32 %v2799_v51, %v380_v57  ;;  %v429_v60 = vpop.f32.mrf.mxu3  ;;  %2142 = vrot.lane.b32.xlu1 %v2141_v56, %s2537_s2  ;;  %v284_v61 = vpop.f32.mrf.mxu0 }
  0xa9   :  { %v482_v63 = vmul.f32 %v2801_v52, %v429_v60  ;;  %v333_v0 = vpop.f32.mrf.mxu1  ;;  %v483_v3 = vmul.f32 %v2783_v41, %v284_v61 }
  0xaa   :  { %v2819_v1 = vadd.f32 %v2805_v55, %v481_v59  ;;  %v484_v7 = vmul.f32 %v2785_v42, %v333_v0 }
  0xab   :  { %v2822_v2 = vadd.f32 %v2809_v58, %v482_v63  ;;  %v2836_v11 = vadd.f32 %v2787_v43, %v483_v3 }
  0xac   :  { %v2146_v6 = vpack.i.bf16 %v2819_v1, %v2797_v50  ;;  %v2840_v13 = vadd.f32 %v2789_v45, %v484_v7 }
  0xad   :  { %v2156_v4 = vpack.i.bf16 %v2822_v2, %v2819_v1  ;;  %v2151_v5 = vpack.i.bf16 -inf, %v2822_v2  ;;  %v2166_v21 = vpack.i.bf16 %v2836_v11, %v3813_v53 }
  0xae   :  { %v2161_v22 = vpack.i.bf16 %v2840_v13, %v2836_v11 }
  0xaf   :  { %2157 = vrot.lane.b32.xlu2 %v2156_v4, %s2537_s2  ;;  %v382_v8 = vpop.f32.mrf.mxu2  ;;  %2147 = vrot.lane.b32.xlu0 %v2146_v6, %s2537_s2 }
  0xb0   :  { %v485_v9 = vmul.f32 %v2799_v51, %v382_v8  ;;  %v431_v10 = vpop.f32.mrf.mxu3  ;;  %2152 = vrot.lane.b32.xlu1 %v2151_v5, %s2537_s2  ;;  %v287_v15 = vpop.f32.mrf.mxu0 }
  0xb1   :  { %v486_v12 = vmul.f32 %v2801_v52, %v431_v10  ;;  %v336_v16 = vpop.f32.mrf.mxu1  ;;  %v487_v18 = vmul.f32 %v2783_v41, %v287_v15 }
  0xb2   :  { %v2843_v14 = vadd.f32 %v2805_v55, %v485_v9  ;;  %v488_v19 = vmul.f32 %v2785_v42, %v336_v16 }
  0xb3   :  { %v2846_v17 = vadd.f32 %v2809_v58, %v486_v12  ;;  %v2857_v23 = vadd.f32 %v2787_v43, %v487_v18 }
  0xb4   :  { %v2860_v24 = vadd.f32 %v2789_v45, %v488_v19  ;;  %v2176_v31 = vpack.i.bf16 %v2843_v14, %v2840_v13 }
  0xb5   :  { %v2171_v20 = vpack.i.bf16 %v2846_v17, %v2843_v14  ;;  %v2181_v30 = vpack.i.bf16 -inf, %v2846_v17  ;;  %v2186_v38 = vpack.i.bf16 %v2857_v23, %v3813_v53 }
  0xb6   :  { %v2191_v27 = vpack.i.bf16 %v2860_v24, %v2857_v23 }
  0xb7   :  { %2172 = vrot.lane.b32.xlu2 %v2171_v20, %s2537_s2  ;;  %2167 = vrot.lane.b32.xlu0 %v2166_v21, %s2537_s2  ;;  %v385_v26 = vpop.f32.mrf.mxu2 }
  0xb8   :  { %2162 = vrot.lane.b32.xlu1 %v2161_v22, %s2537_s2  ;;  %v434_v25 = vpop.f32.mrf.mxu3  ;;  %v489_v29 = vmul.f32 %v2799_v51, %v385_v26  ;;  %v289_v34 = vpop.f32.mrf.mxu0 }
  0xb9   :  { %v490_v28 = vmul.f32 %v2801_v52, %v434_v25  ;;  %v338_v35 = vpop.f32.mrf.mxu1  ;;  %v491_v40 = vmul.f32 %v2783_v41, %v289_v34 }
  0xba   :  { %v2879_v33 = vadd.f32 %v2805_v55, %v489_v29  ;;  %v492_v44 = vmul.f32 %v2785_v42, %v338_v35 }
  0xbb   :  { %v2875_v32 = vadd.f32 %v2809_v58, %v490_v28  ;;  %v2894_v54 = vadd.f32 %v2787_v43, %v491_v40 }
  0xbc   :  { %v2196_v47 = vpack.i.bf16 %v2879_v33, %v2860_v24  ;;  %v2897_v56 = vadd.f32 %v2789_v45, %v492_v44 }
  0xbd   :  { %v2201_v39 = vpack.i.bf16 -inf, %v2875_v32  ;;  %v2206_v62 = vpack.i.bf16 %v2875_v32, %v2879_v33  ;;  %v2216_v7 = vpack.i.bf16 %v2894_v54, %v3813_v53 }
  0xbe   :  { %v2211_v60 = vpack.i.bf16 %v2897_v56, %v2894_v54 }
  0xbf   :  { %2182 = vrot.lane.b32.xlu2 %v2181_v30, %s2537_s2  ;;  %2192 = vrot.lane.b32.xlu0 %v2191_v27, %s2537_s2  ;;  %v387_v37 = vpop.f32.mrf.mxu2 }
  0xc0   :  { %2177 = vrot.lane.b32.xlu1 %v2176_v31, %s2537_s2  ;;  %v436_v36 = vpop.f32.mrf.mxu3  ;;  %v493_v48 = vmul.f32 %v2799_v51, %v387_v37  ;;  %v292_v63 = vpop.f32.mrf.mxu0 }
  0xc1   :  { %v494_v46 = vmul.f32 %v2801_v52, %v436_v36  ;;  %v341_v0 = vpop.f32.mrf.mxu1  ;;  %v495_v5 = vmul.f32 %v2783_v41, %v292_v63 }
  0xc2   :  { %v2903_v59 = vadd.f32 %v2805_v55, %v493_v48  ;;  %v496_v6 = vmul.f32 %v2785_v42, %v341_v0 }
  0xc3   :  { %v2900_v57 = vadd.f32 %v2809_v58, %v494_v46  ;;  %v2926_v12 = vadd.f32 %v2787_v43, %v495_v5 }
  0xc4   :  { %v2226_v8 = vpack.i.bf16 %v2903_v59, %v2897_v56  ;;  %v2929_v15 = vadd.f32 %v2789_v45, %v496_v6 }
  0xc5   :  { %v2221_v61 = vpack.i.bf16 %v2900_v57, %v2903_v59  ;;  %v2231_v9 = vpack.i.bf16 -inf, %v2900_v57  ;;  %v2236_v22 = vpack.i.bf16 %v2926_v12, %v3813_v53 }
  0xc6   :  { %v2241_v20 = vpack.i.bf16 %v2929_v15, %v2926_v12 }
  0xc7   :  { %2187 = vrot.lane.b32.xlu2 %v2186_v38, %s2537_s2  ;;  %2197 = vrot.lane.b32.xlu0 %v2196_v47, %s2537_s2  ;;  %v390_v16 = vpop.f32.mrf.mxu2 }
  0xc8   :  { %2202 = vrot.lane.b32.xlu1 %v2201_v39, %s2537_s2  ;;  %v439_v3 = vpop.f32.mrf.mxu3  ;;  %v294_v18 = vpop.f32.mrf.mxu0  ;;  %v497_v25 = vmul.f32 %v2799_v51, %v390_v16 }
  0xc9   :  { %v498_v4 = vmul.f32 %v2801_v52, %v439_v3  ;;  %v343_v19 = vpop.f32.mrf.mxu1  ;;  %v499_v26 = vmul.f32 %v2783_v41, %v294_v18 }
  0xca   :  { %v500_v27 = vmul.f32 %v2785_v42, %v343_v19  ;;  %v2946_v28 = vadd.f32 %v2805_v55, %v497_v25 }
  0xcb   :  { %v2923_v10 = vadd.f32 %v2809_v58, %v498_v4  ;;  %v2949_v31 = vadd.f32 %v2787_v43, %v499_v26 }
  0xcc   :  { %v2952_v34 = vadd.f32 %v2789_v45, %v500_v27  ;;  %v2246_v37 = vpack.i.bf16 %v2946_v28, %v2929_v15 }
  0xcd   :  { %3859 = vst [vmem:[#allocation3_spill] sm:$0xff] %v2923_v10  ;;  %v2251_v21 = vpack.i.bf16 -inf, %v2923_v10  ;;  %v2256_v38 = vpack.i.bf16 %v2923_v10, %v2946_v28  ;;  %v2266_v63 = vpack.i.bf16 %v2949_v31, %v3813_v53 }
  0xce   :  { %3860 = vst [vmem:[#allocation4_spill] sm:$0xff] %v2952_v34  ;;  %v2261_v39 = vpack.i.bf16 %v2952_v34, %v2949_v31 }
  0xcf   :  { %2212 = vrot.lane.b32.xlu2 %v2211_v60, %s2537_s2  ;;  %2222 = vrot.lane.b32.xlu0 %v2221_v61, %s2537_s2  ;;  %v392_v29 = vpop.f32.mrf.mxu2 }
  0xd0   :  { %2207 = vrot.lane.b32.xlu1 %v2206_v62, %s2537_s2  ;;  %v441_v30 = vpop.f32.mrf.mxu3  ;;  %v501_v35 = vmul.f32 %v2799_v51, %v392_v29  ;;  %v297_v40 = vpop.f32.mrf.mxu0 }
  0xd1   :  { %v502_v36 = vmul.f32 %v2801_v52, %v441_v30  ;;  %v346_v44 = vpop.f32.mrf.mxu1  ;;  %v503_v48 = vmul.f32 %v2783_v41, %v297_v40 }
  0xd2   :  { %v2966_v46 = vadd.f32 %v2805_v55, %v501_v35  ;;  %v504_v60 = vmul.f32 %v2785_v42, %v346_v44 }
  0xd3   :  { %v2969_v47 = vadd.f32 %v2809_v58, %v502_v36  ;;  %v2979_v0 = vadd.f32 %v2787_v43, %v503_v48 }
  0xd4   :  { %v2984_v3 = vadd.f32 %v2789_v45, %v504_v60 }
  0xd5   :  { %3861 = vst [vmem:[#allocation5_spill] sm:$0xff] %v2969_v47  ;;  %v2271_v61 = vpack.i.bf16 %v2969_v47, %v2966_v46  ;;  %v2281_v62 = vpack.i.bf16 -inf, %v2969_v47 }
  0xd6   :  { %3862 = vst [vmem:[#allocation6_spill] sm:$0xff] %v2979_v0  ;;  %v2291_v16 = vpack.i.bf16 %v2984_v3, %v2979_v0 }
  0xd7   :  { %2217 = vrot.lane.b32.xlu2 %v2216_v7, %s2537_s2  ;;  %2227 = vrot.lane.b32.xlu0 %v2226_v8, %s2537_s2  ;;  %3863 = vst [vmem:[#allocation7_spill] sm:$0xff] %v2984_v3  ;;  %v395_v7 = vpop.f32.mrf.mxu2 }
  0xd8   :  { %2232 = vrot.lane.b32.xlu1 %v2231_v9, %s2537_s2  ;;  %v444_v4 = vpop.f32.mrf.mxu3  ;;  %v299_v5 = vpop.f32.mrf.mxu0  ;;  %v2286_v9 = vpack.i.bf16 %v2979_v0, %v3813_v53 }
  0xd9   :  { %v348_v6 = vpop.f32.mrf.mxu1  ;;  %v506_v8 = vmul.f32 %v2801_v52, %v444_v4  ;;  %v507_v18 = vmul.f32 %v2783_v41, %v299_v5 }
  0xda   :  { %v508_v19 = vmul.f32 %v2785_v42, %v348_v6 }
  0xdb   :  { %v3004_v25 = vadd.f32 %v2787_v43, %v507_v18 }
  0xdc   :  { %v3007_v26 = vadd.f32 %v2789_v45, %v508_v19 }
  0xdd   :  { %3865 = vst [vmem:[#allocation9_spill] sm:$0xff] %v3004_v25  ;;  %v2316_v4 = vpack.i.bf16 %v3004_v25, %v3813_v53 }
  0xde   :  { %3866 = vst [vmem:[#allocation10_spill] sm:$0xff] %v3007_v26  ;;  %v2311_v36 = vpack.i.bf16 %v3007_v26, %v3004_v25 }
  0xdf   :  { %2242 = vrot.lane.b32.xlu2 %v2241_v20, %s2537_s2  ;;  %2252 = vrot.lane.b32.xlu0 %v2251_v21, %s2537_s2  ;;  %v2276_v20 = vpack.i.bf16 %v2966_v46, %v2952_v34  ;;  %v505_v21 = vmul.f32 %v2799_v51, %v395_v7  ;;  %v397_v35 = vpop.f32.mrf.mxu2 }
  0xe0   :  { %2237 = vrot.lane.b32.xlu1 %v2236_v22, %s2537_s2  ;;  %v2998_v22 = vadd.f32 %v2809_v58, %v506_v8  ;;  %v446_v29 = vpop.f32.mrf.mxu3  ;;  %v302_v44 = vpop.f32.mrf.mxu0 }
  0xe1   :  { %v3010_v27 = vadd.f32 %v2805_v55, %v505_v21  ;;  %v351_v48 = vpop.f32.mrf.mxu1  ;;  %v511_v60 = vmul.f32 %v2783_v41, %v302_v44 }
  0xe2   :  { %3864 = vst [vmem:[#allocation8_spill] sm:$0xff] %v2998_v22  ;;  %v2301_v30 = vpack.i.bf16 -inf, %v2998_v22 }
  0xe3   :  { %3867 = vst [vmem:[#allocation11_spill] sm:$0xff] %v3010_v27  ;;  %v3037_v6 = vadd.f32 %v2787_v43, %v511_v60 }
  0xe5   :  { %3870 = vst [vmem:[#allocation14_spill] sm:$0xff] %v3037_v6 }
  0xe7   :  { %2247 = vrot.lane.b32.xlu2 %v2246_v37, %s2537_s2  ;;  %2257 = vrot.lane.b32.xlu0 %v2256_v38, %s2537_s2  ;;  %v510_v37 = vmul.f32 %v2801_v52, %v446_v29  ;;  %v2296_v38 = vpack.i.bf16 %v3010_v27, %v2984_v3 }
  0xe8   :  { %2262 = vrot.lane.b32.xlu1 %v2261_v39, %s2537_s2  ;;  %v509_v39 = vmul.f32 %v2799_v51, %v397_v35  ;;  %v449_v8 = vpop.f32.mrf.mxu3 }
  0xe9   :  { %v3023_v40 = vadd.f32 %v2809_v58, %v510_v37  ;;  %v514_v19 = vmul.f32 %v2801_v52, %v449_v8 }
  0xeb   :  { %3868 = vst [vmem:[#allocation12_spill] sm:$0xff] %v3023_v40  ;;  %v2331_v21 = vpack.i.bf16 -inf, %v3023_v40 }
  0xef   :  { %2272 = vrot.lane.b32.xlu2 %v2271_v61, %s2537_s2  ;;  %2282 = vrot.lane.b32.xlu0 %v2281_v62, %s2537_s2  ;;  %v512_v61 = vmul.f32 %v2785_v42, %v351_v48  ;;  %v3028_v62 = vadd.f32 %v2805_v55, %v509_v39 }
  0xf0   :  { %2267 = vrot.lane.b32.xlu1 %v2266_v63, %s2537_s2  ;;  %v2306_v63 = vpack.i.bf16 %v2998_v22, %v3010_v27  ;;  %v451_v39 = vpop.f32.mrf.mxu3 }
  0xf1   :  { %3869 = vst [vmem:[#allocation13_spill] sm:$0xff] %v3028_v62  ;;  %v2321_v5 = vpack.i.bf16 %v3023_v40, %v3028_v62  ;;  %v3040_v7 = vadd.f32 %v2789_v45, %v512_v61  ;;  %v2326_v29 = vpack.i.bf16 %v3028_v62, %v3007_v26 }
  0xf3   :  { %3871 = vst [vmem:[#allocation15_spill] sm:$0xff] %v3040_v7  ;;  %v2341_v18 = vpack.i.bf16 %v3040_v7, %v3037_v6 }
  0xf7   :  { %2277 = vrot.lane.b32.xlu2 %v2276_v20, %s2537_s2  ;;  %2287 = vrot.lane.b32.xlu0 %v2286_v9, %s2537_s2 }
  0xf8   :  { %2292 = vrot.lane.b32.xlu1 %v2291_v16, %s2537_s2  ;;  %v400_v16 = vpop.f32.mrf.mxu2 }
  0xf9   :  { %v513_v20 = vmul.f32 %v2799_v51, %v400_v16 }
  0xfb   :  { %v3061_v35 = vadd.f32 %v2805_v55, %v513_v20 }
  0xfd   :  { %3873 = vst [vmem:[#allocation17_spill] sm:$0xff] %v3061_v35 }
  0xff   :  { %2302 = vrot.lane.b32.xlu2 %v2301_v30, %s2537_s2  ;;  %2312 = vrot.lane.b32.xlu0 %v2311_v36, %s2537_s2  ;;  %v3057_v30 = vadd.f32 %v2809_v58, %v514_v19  ;;  %v304_v36 = vpop.f32.mrf.mxu0 }
 0x100   :  { %2297 = vrot.lane.b32.xlu1 %v2296_v38, %s2537_s2  ;;  %v353_v38 = vpop.f32.mrf.mxu1  ;;  %v515_v44 = vmul.f32 %v2783_v41, %v304_v36  ;;  %v402_v48 = vpop.f32.mrf.mxu2 }
 0x101   :  { %3872 = vst [vmem:[#allocation16_spill] sm:$0xff] %v3057_v30  ;;  %v2351_v60 = vpack.i.bf16 -inf, %v3057_v30  ;;  %v516_v61 = vmul.f32 %v2785_v42, %v353_v38  ;;  %v517_v8 = vmul.f32 %v2799_v51, %v402_v48 }
 0x102   :  { %v3078_v16 = vadd.f32 %v2787_v43, %v515_v44 }
 0x103   :  { %v3089_v36 = vadd.f32 %v2805_v55, %v517_v8 }
 0x104   :  { %3874 = vst [vmem:[#allocation18_spill] sm:$0xff] %v3078_v16 }
 0x105   :  { %3877 = vst [vmem:[#allocation21_spill] sm:$0xff] %v3089_v36 }
 0x107   :  { %2307 = vrot.lane.b32.xlu2 %v2306_v63, %s2537_s2  ;;  %2317 = vrot.lane.b32.xlu0 %v2316_v4, %s2537_s2  ;;  %v518_v63 = vmul.f32 %v2801_v52, %v451_v39  ;;  %v2336_v4 = vpack.i.bf16 %v3037_v6, %v3813_v53  ;;  %v307_v48 = vpop.f32.mrf.mxu0 }
 0x108   :  { %2322 = vrot.lane.b32.xlu1 %v2321_v5, %s2537_s2  ;;  %v2346_v5 = vpack.i.bf16 %v3061_v35, %v3040_v7 }
 0x109   :  { %v3045_v9 = vpop.permute.xlu2 %2157  ;;  %v3084_v19 = vadd.f32 %v2809_v58, %v518_v63  ;;  %v2356_v63 = vpack.i.bf16 %v3057_v30, %v3061_v35  ;;  %v3878_v35 = vmov -inf  }
 0x10b   :  { %3876 = vst [vmem:[#allocation20_spill] sm:$0xff] %v3084_v19  ;;  %v2381_v3 = vpack.i.bf16 -inf, %v3084_v19 }
 0x10f   :  { %2332 = vrot.lane.b32.xlu2 %v2331_v21, %s2537_s2  ;;  %2342 = vrot.lane.b32.xlu0 %v2341_v18, %s2537_s2  ;;  %v3081_v18 = vadd.f32 %v2789_v45, %v516_v61  ;;  %v2371_v61 = vpack.i.bf16 %v3084_v19, %v3089_v36 }
 0x110   :  { %2327 = vrot.lane.b32.xlu1 %v2326_v29, %s2537_s2 }
 0x111   :  { %v3063_v37 = vpop.permute.xlu2 %2172  ;;  %3875 = vst [vmem:[#allocation19_spill] sm:$0xff] %v3081_v18  ;;  %v2361_v44 = vpack.i.bf16 %v3081_v18, %v3078_v16 }
 0x117   :  { %2337 = vrot.lane.b32.xlu2 %v2336_v4, %s2537_s2  ;;  %2347 = vrot.lane.b32.xlu0 %v2346_v5, %s2537_s2  ;;  %v405_v4 = vpop.f32.mrf.mxu2  ;;  %v454_v5 = vpop.f32.mrf.mxu3 }
 0x118   :  { %2352 = vrot.lane.b32.xlu1 %v2351_v60, %s2537_s2  ;;  %v356_v60 = vpop.f32.mrf.mxu1  ;;  %v522_v8 = vmul.f32 %v2801_v52, %v454_v5  ;;  %v521_v5 = vmul.f32 %v2799_v51, %v405_v4 }
 0x119   :  { %v3086_v20 = vpop.permute.xlu2 %2182  ;;  %v2138_v21 = vpop.permute.xlu0 %2137  ;;  %v520_v7 = vmul.f32 %v2785_v42, %v356_v60  ;;  %v2160_v60 = vunpack.i.h.bf16 %v3045_v9 }
 0x11a   :  { %v2143_v29 = vpop.permute.xlu1 %2142  ;;  %v2140_v38 = vunpack.i.h.bf16 %v2138_v21  ;;  %v2139_v39 = vunpack.i.l.bf16 %v2138_v21  ;;  %v519_v21 = vmul.f32 %v2783_v41, %v307_v48  ;;  %v3117_v25 = vadd.f32 %v2809_v58, %v522_v8 }
 0x11b   :  { %v2145_v6 = vunpack.i.h.bf16 %v2143_v29  ;;  %v2144_v40 = vunpack.i.l.bf16 %v2143_v29  ;;  %v2159_v29 = vunpack.i.l.bf16 %v3045_v9  ;;  %v3126_v4 = vadd.f32 %v2789_v45, %v520_v7 }
 0x11c   :  { %v1034_v53 = vsel %vm1033_vm0, %v2139_v39, %v2140_v38  ;;  %v2366_v39 = vpack.i.bf16 %v3078_v16, %v3878_v35  ;;  %3879 = vst [vmem:[#allocation22_spill] sm:$0xff] %v3117_v25 }
 0x11f   :  { %2362 = vrot.lane.b32.xlu2 %v2361_v44, %s2537_s2  ;;  %2372 = vrot.lane.b32.xlu0 %v2371_v61, %s2537_s2  ;;  %v2376_v44 = vpack.i.bf16 %v3089_v36, %v3081_v18  ;;  %v1226_v61 = vmax.f32 %v1034_v53, %v2794_v49  ;;  %v3123_v53 = vadd.f32 %v2787_v43, %v519_v21 }
 0x120   :  { %2357 = vrot.lane.b32.xlu1 %v2356_v63, %s2537_s2  ;;  %v358_v0 = vpop.f32.mrf.mxu1 }
 0x121   :  { %v3104_v62 = vpop.permute.xlu2 %2187  ;;  %v2148_v30 = vpop.permute.xlu0 %2147  ;;  %v2386_v47 = vpack.i.bf16 %v3123_v53, %v3878_v35 }
 0x122   :  { %v3112_v63 = vpop.permute.xlu1 %2152  ;;  %v2150_v48 = vunpack.i.h.bf16 %v2148_v30  ;;  %v2149_v26 = vunpack.i.l.bf16 %v2148_v30  ;;  %v1610_v30 = vsel %vm1033_vm0, %v2144_v40, %v2145_v6  ;;  %v1612_v40 = vsel %vm1033_vm0, %v2159_v29, %v2160_v60 }
 0x123   :  { %v2154_v16 = vunpack.i.l.bf16 %v3112_v63  ;;  %v1738_v27 = vmax.f32 %v1226_v61, %v1610_v30 }
 0x124   :  { %v1035_v22 = vsel %vm1033_vm0, %v2140_v38, %v2149_v26  ;;  %v1036_v36 = vsel %vm1033_vm0, %v2149_v26, %v2150_v48  ;;  %v309_v38 = vpop.f32.mrf.mxu0 }
 0x125   :  { %v1037_v18 = vsel %vm1033_vm0, %v2150_v48, %v2154_v16  ;;  %v1163_v9 = vmax.f32 %v2794_v49, %v1035_v22  ;;  %v1164_v8 = vmax.f32 %v2797_v50, %v1036_v36  ;;  %v1611_v49 = vsel %vm1033_vm0, %v2145_v6, %v2159_v29  ;;  %v407_v16 = vpop.f32.mrf.mxu2  ;;  %v456_v36 = vpop.f32.mrf.mxu3 }
 0x126   :  { %v1165_v26 = vmax.f32 %v2819_v1, %v1037_v18  ;;  %v3141_v22 = vadd.f32 %v2805_v55, %v521_v5  ;;  %v2174_v6 = vunpack.i.l.bf16 %v3063_v37  ;;  %v1802_v5 = vmax.f32 %v1738_v27, %v2797_v50 }
 0x127   :  { %v1227_v21 = vmax.f32 %v1163_v9, %v2797_v50  ;;  %v1228_v7 = vmax.f32 %v1164_v8, %v2819_v1  ;;  %2367 = vrot.lane.b32.xlu2 %v2366_v39, %s2537_s2  ;;  %2377 = vrot.lane.b32.xlu0 %v2376_v44, %s2537_s2  ;;  %v2391_v39 = vpack.i.bf16 %v3126_v4, %v3123_v53  ;;  %v2401_v44 = vpack.i.bf16 -inf, %v3117_v25 }
 0x128   :  { %2382 = vrot.lane.b32.xlu1 %v2381_v3, %s2537_s2  ;;  %v2175_v9 = vunpack.i.h.bf16 %v3063_v37  ;;  %v526_v19 = vmul.f32 %v2801_v52, %v456_v36 }
 0x129   :  { %v1739_v18 = vmax.f32 %v1227_v21, %v1611_v49  ;;  %v1740_v61 = vmax.f32 %v1228_v7, %v1612_v40  ;;  %v3144_v48 = vpop.permute.xlu2 %2212  ;;  %v2168_v30 = vpop.permute.xlu0 %2167  ;;  %v1229_v21 = vmax.f32 %v1165_v26, %v2822_v2  ;;  %v525_v49 = vmul.f32 %v2799_v51, %v407_v16 }
 0x12a   :  { %v2169_v29 = vunpack.i.l.bf16 %v2168_v30  ;;  %v2163_v3 = vpop.permute.xlu1 %2162  ;;  %v524_v16 = vmul.f32 %v2785_v42, %v358_v0 }
 0x12b   :  { %v1803_v8 = vmax.f32 %v1739_v18, %v2819_v1  ;;  %v2165_v7 = vunpack.i.h.bf16 %v2163_v3  ;;  %v2164_v40 = vunpack.i.l.bf16 %v2163_v3  ;;  %v1804_v50 = vmax.f32 %v1740_v61, %v2822_v2  ;;  %v361_v3 = vpop.f32.mrf.mxu1 }
 0x12c   :  { %v1613_v10 = vsel %vm1033_vm0, %v2160_v60, %v2169_v29  ;;  %v1041_v1 = vsel %vm1033_vm0, %v2174_v6, %v2175_v9  ;;  %v523_v18 = vmul.f32 %v2783_v41, %v309_v38  ;;  %v312_v36 = vpop.f32.mrf.mxu0  ;;  %v2155_v60 = vunpack.i.h.bf16 %v3112_v63 }
 0x12d   :  { %v1866_v37 = vpack.c.bf16 %v1803_v8, %v1802_v5  ;;  %v1741_v27 = vmax.f32 %v1229_v21, %v1613_v10  ;;  %v1040_v34 = vsel %vm1033_vm0, %v2165_v7, %v2174_v6  ;;  %v1039_v26 = vsel %vm1033_vm0, %v2164_v40, %v2165_v7 }
 0x12e   :  { %v2185_v10 = vunpack.i.h.bf16 %v3086_v20  ;;  %v2184_v61 = vunpack.i.l.bf16 %v3086_v20  ;;  %v1168_v38 = vmax.f32 %v2840_v13, %v1040_v34  ;;  %v1167_v0 = vmax.f32 %v2836_v11, %v1039_v26 }
 0x12f   :  { %1898 = vst [vmem:[%s3812_s4] sm:$0xff] %v1866_v37  ;;  %v1867_v2 = vpack.c.bf16 %v1741_v27, %v1804_v50  ;;  %2392 = vrot.lane.b32.xlu2 %v2391_v39, %s2537_s2  ;;  %2402 = vrot.lane.b32.xlu0 %v2401_v44, %s2537_s2  ;;  %v1169_v63 = vmax.f32 %v2843_v14, %v1041_v1  ;;  %v2170_v8 = vunpack.i.h.bf16 %v2168_v30 }
 0x130   :  { %2387 = vrot.lane.b32.xlu1 %v2386_v47, %s2537_s2  ;;  %v3178_v9 = vadd.f32 %v2805_v55, %v525_v49  ;;  %v1038_v39 = vsel %vm1033_vm0, %v2155_v60, %v2164_v40  ;;  %v3189_v34 = vadd.f32 %v2809_v58, %v526_v19  ;;  %v3192_v47 = vadd.f32 %v2787_v43, %v523_v18 }
 0x131   :  { %1899 = vst [vmem:[%s3812_s4 + $0x8] sm:$0xff] %v1867_v2  ;;  %v3184_v44 = vpop.permute.xlu2 %2217  ;;  %v3186_v20 = vpop.permute.xlu0 %2192  ;;  %v3195_v6 = vadd.f32 %v2789_v45, %v524_v16  ;;  %v2406_v29 = vpack.i.bf16 %v3117_v25, %v3141_v22  ;;  %v2396_v40 = vpack.i.bf16 %v3141_v22, %v3126_v4  ;;  %v1617_v49 = vsel %vm1033_vm0, %v2184_v61, %v2185_v10 }
 0x132   :  { %3880 = vst [vmem:[#allocation23_spill] sm:$0xff] %v3189_v34  ;;  %v2178_v5 = vpop.permute.xlu1 %2177  ;;  %v1230_v19 = vmax.f32 %v1038_v39, %v2836_v11  ;;  %v1231_v37 = vmax.f32 %v1167_v0, %v2840_v13  ;;  %v1232_v50 = vmax.f32 %v1168_v38, %v2843_v14  ;;  %v1233_v27 = vmax.f32 %v1169_v63, %v2846_v17 }
 0x133   :  { %v2180_v21 = vunpack.i.h.bf16 %v2178_v5  ;;  %v2179_v7 = vunpack.i.l.bf16 %v2178_v5  ;;  %v2411_v2 = vpack.i.bf16 %v3195_v6, %v3192_v47  ;;  %v2190_v11 = vunpack.i.h.bf16 %v3104_v62 }
 0x134   :  { %v1745_v10 = vmax.f32 %v1233_v27, %v1617_v49  ;;  %v527_v38 = vmul.f32 %v2783_v41, %v312_v36  ;;  %v2189_v0 = vunpack.i.l.bf16 %v3104_v62  ;;  %v2421_v36 = vpack.i.bf16 %v3189_v34, %v3178_v9 }
 0x135   :  { %v1616_v1 = vsel %vm1033_vm0, %v2180_v21, %v2184_v61  ;;  %v1614_v26 = vsel %vm1033_vm0, %v2170_v8, %v2179_v7  ;;  %v1615_v30 = vsel %vm1033_vm0, %v2179_v7, %v2180_v21  ;;  %v410_v61 = vpop.f32.mrf.mxu2  ;;  %v314_v8 = vpop.f32.mrf.mxu0 }
 0x136   :  { %v1742_v18 = vmax.f32 %v1230_v19, %v1614_v26  ;;  %v1743_v16 = vmax.f32 %v1231_v37, %v1615_v30  ;;  %v1744_v60 = vmax.f32 %v1232_v50, %v1616_v1  ;;  %v363_v21 = vpop.f32.mrf.mxu1  ;;  %v531_v1 = vmul.f32 %v2783_v41, %v314_v8 }
 0x137   :  { %2397 = vrot.lane.b32.xlu2 %v2396_v40, %s2537_s2  ;;  %2407 = vrot.lane.b32.xlu0 %v2406_v29, %s2537_s2  ;;  %v528_v40 = vmul.f32 %v2785_v42, %v361_v3  ;;  %v1042_v3 = vsel %vm1033_vm0, %v2189_v0, %v2190_v11  ;;  %v2195_v26 = vunpack.i.h.bf16 %v3186_v20  ;;  %v2194_v30 = vunpack.i.l.bf16 %v3186_v20 }
 0x138   :  { %v1806_v63 = vmax.f32 %v1742_v18, %v2840_v13  ;;  %v1807_v39 = vmax.f32 %v1743_v16, %v2843_v14  ;;  %v1808_v5 = vmax.f32 %v1744_v60, %v2846_v17  ;;  %2412 = vrot.lane.b32.xlu1 %v2411_v2, %s2537_s2  ;;  %v529_v13 = vmul.f32 %v2799_v51, %v410_v61  ;;  %v459_v17 = vpop.f32.mrf.mxu3 }
 0x139   :  { %v3220_v7 = vpop.permute.xlu2 %2242  ;;  %v2198_v29 = vpop.permute.xlu0 %2197  ;;  %v2431_v14 = vpack.i.bf16 -inf, %v3189_v34  ;;  %v3238_v18 = vadd.f32 %v2787_v43, %v527_v38  ;;  %v3244_v16 = vadd.f32 %v2789_v45, %v528_v40  ;;  %v2416_v20 = vpack.i.bf16 %v3192_v47, %v3878_v35 }
 0x13a   :  { %v1868_v49 = vpack.c.bf16 %v1807_v39, %v1806_v63  ;;  %v1869_v62 = vpack.c.bf16 %v1745_v10, %v1808_v5  ;;  %v3226_v19 = vpop.permute.xlu1 %2202  ;;  %v2200_v50 = vunpack.i.h.bf16 %v2198_v29  ;;  %v2199_v27 = vunpack.i.l.bf16 %v2198_v29 }
 0x13b   :  { %v2204_v37 = vunpack.i.l.bf16 %v3226_v19  ;;  %3881 = vst [vmem:[#allocation24_spill] sm:$0xff] %v3238_v18  ;;  %v532_v10 = vmul.f32 %v2785_v42, %v363_v21  ;;  %v3250_v61 = vadd.f32 %v2805_v55, %v529_v13  ;;  %v2426_v38 = vpack.i.bf16 %v3178_v9, %v3195_v6 }
 0x13c   :  { %1900 = vst [vmem:[%s3812_s4 + $0x10] sm:$0xff] %v1868_v49  ;;  %v1043_v60 = vsel %vm1033_vm0, %v2190_v11, %v2199_v27  ;;  %v1044_v2 = vsel %vm1033_vm0, %v2199_v27, %v2200_v50  ;;  %v1234_v0 = vmax.f32 %v1042_v3, %v2857_v23  ;;  %v3261_v11 = vadd.f32 %v2787_v43, %v531_v1 }
 0x13d   :  { %1901 = vst [vmem:[%s3812_s4 + $0x18] sm:$0xff] %v1869_v62  ;;  %v1045_v63 = vsel %vm1033_vm0, %v2200_v50, %v2204_v37  ;;  %v1618_v39 = vsel %vm1033_vm0, %v2194_v30, %v2195_v26  ;;  %v1171_v5 = vmax.f32 %v2857_v23, %v1043_v60  ;;  %v1172_v8 = vmax.f32 %v2860_v24, %v1044_v2  ;;  %v412_v2 = vpop.f32.mrf.mxu2 }
 0x13e   :  { %v530_v21 = vmul.f32 %v2801_v52, %v459_v17  ;;  %v2215_v40 = vunpack.i.h.bf16 %v3144_v48  ;;  %v2441_v62 = vpack.i.bf16 %v3244_v16, %v3238_v18  ;;  %v2436_v23 = vpack.i.bf16 %v3238_v18, %v3878_v35 }
 0x13f   :  { %2422 = vrot.lane.b32.xlu2 %v2421_v36, %s2537_s2  ;;  %2432 = vrot.lane.b32.xlu0 %v2431_v14, %s2537_s2  ;;  %v3272_v36 = vadd.f32 %v2789_v45, %v532_v10  ;;  %v2214_v13 = vunpack.i.l.bf16 %v3144_v48  ;;  %v2219_v14 = vunpack.i.l.bf16 %v3184_v44  ;;  %v1173_v17 = vmax.f32 %v2879_v33, %v1045_v63 }
 0x140   :  { %2417 = vrot.lane.b32.xlu1 %v2416_v20, %s2537_s2  ;;  %v1746_v27 = vmax.f32 %v1234_v0, %v1618_v39  ;;  %v2205_v60 = vunpack.i.h.bf16 %v3226_v19  ;;  %v3283_v10 = vadd.f32 %v2809_v58, %v530_v21  ;;  %v1235_v20 = vmax.f32 %v1171_v5, %v2860_v24  ;;  %v461_v18 = vpop.f32.mrf.mxu3 }
 0x141   :  { %v3269_v29 = vpop.permute.xlu2 %2247  ;;  %v2223_v49 = vpop.permute.xlu0 %2222  ;;  %v1236_v48 = vmax.f32 %v1172_v8, %v2879_v33  ;;  %v1237_v19 = vmax.f32 %v1173_v17, %v2875_v32  ;;  %v533_v5 = vmul.f32 %v2799_v51, %v412_v2 }
 0x142   :  { %v2208_v37 = vpop.permute.xlu1 %2207  ;;  %v2224_v50 = vunpack.i.l.bf16 %v2223_v49  ;;  %v2225_v30 = vunpack.i.h.bf16 %v2223_v49  ;;  %v1047_v49 = vsel %vm1033_vm0, %v2214_v13, %v2215_v40  ;;  %v1810_v34 = vmax.f32 %v1746_v27, %v2860_v24 }
 0x143   :  { %v2210_v1 = vunpack.i.h.bf16 %v2208_v37  ;;  %v2209_v3 = vunpack.i.l.bf16 %v2208_v37  ;;  %v1046_v24 = vsel %vm1033_vm0, %v2205_v60, %v2214_v13  ;;  %v2220_v27 = vunpack.i.h.bf16 %v3184_v44  ;;  %v317_v60 = vpop.f32.mrf.mxu0 }
 0x144   :  { %v1048_v39 = vsel %vm1033_vm0, %v2215_v40, %v2224_v50  ;;  %v1049_v8 = vsel %vm1033_vm0, %v2224_v50, %v2225_v30  ;;  %v534_v50 = vmul.f32 %v2801_v52, %v461_v18  ;;  %v1238_v13 = vmax.f32 %v1046_v24, %v2894_v54 }
 0x145   :  { %v1619_v25 = vsel %vm1033_vm0, %v2195_v26, %v2209_v3  ;;  %v1620_v63 = vsel %vm1033_vm0, %v2209_v3, %v2210_v1  ;;  %v1621_v0 = vsel %vm1033_vm0, %v2210_v1, %v2219_v14  ;;  %v1176_v40 = vmax.f32 %v2897_v56, %v1048_v39 }
 0x146   :  { %v1747_v37 = vmax.f32 %v1235_v20, %v1619_v25  ;;  %v1748_v21 = vmax.f32 %v1236_v48, %v1620_v63  ;;  %v1749_v26 = vmax.f32 %v1237_v19, %v1621_v0  ;;  %v1175_v25 = vmax.f32 %v2894_v54, %v1047_v49  ;;  %v366_v49 = vpop.f32.mrf.mxu1 }
 0x147   :  { %2427 = vrot.lane.b32.xlu2 %v2426_v38, %s2537_s2  ;;  %2437 = vrot.lane.b32.xlu0 %v2436_v23, %s2537_s2  ;;  %v2451_v23 = vpack.i.bf16 -inf, %v3283_v10  ;;  %v1240_v18 = vmax.f32 %v1176_v40, %v2903_v59  ;;  %v2446_v44 = vpack.i.bf16 %v3250_v61, %v3244_v16  ;;  %v535_v24 = vmul.f32 %v2783_v41, %v317_v60 }
 0x148   :  { %v1811_v14 = vmax.f32 %v1747_v37, %v2879_v33  ;;  %v1812_v1 = vmax.f32 %v1748_v21, %v2875_v32  ;;  %2442 = vrot.lane.b32.xlu1 %v2441_v62, %s2537_s2  ;;  %v1177_v32 = vmax.f32 %v2903_v59, %v1049_v8  ;;  %v1239_v0 = vmax.f32 %v1175_v25, %v2897_v56 }
 0x149   :  { %v3304_v17 = vpop.permute.xlu2 %2272  ;;  %v2228_v38 = vpop.permute.xlu0 %2227 }
 0x14a   :  { %v1870_v33 = vpack.c.bf16 %v1811_v14, %v1810_v34  ;;  %v1871_v3 = vpack.c.bf16 %v1749_v26, %v1812_v1  ;;  %v2233_v30 = vpop.permute.xlu1 %2232  ;;  %v2230_v20 = vunpack.i.h.bf16 %v2228_v38  ;;  %v2229_v48 = vunpack.i.l.bf16 %v2228_v38  ;;  %v415_v26 = vpop.f32.mrf.mxu2 }
 0x14b   :  { %v2235_v2 = vunpack.i.h.bf16 %v2233_v30  ;;  %v2234_v62 = vunpack.i.l.bf16 %v2233_v30  ;;  %v2461_v34 = vpack.i.bf16 %v3272_v36, %v3261_v11  ;;  %v1241_v19 = vmax.f32 %v1177_v32, %v2900_v57  ;;  %v464_v14 = vpop.f32.mrf.mxu3 }
 0x14c   :  { %1902 = vst [vmem:[%s3812_s4 + $0x20] sm:$0xff] %v1870_v33  ;;  %v1622_v39 = vsel %vm1033_vm0, %v2220_v27, %v2229_v48  ;;  %v1623_v37 = vsel %vm1033_vm0, %v2229_v48, %v2230_v20  ;;  %v3329_v1 = vadd.f32 %v2809_v58, %v534_v50  ;;  %v536_v33 = vmul.f32 %v2785_v42, %v366_v49 }
 0x14d   :  { %1903 = vst [vmem:[%s3812_s4 + $0x28] sm:$0xff] %v1871_v3  ;;  %v1625_v63 = vsel %vm1033_vm0, %v2234_v62, %v2235_v2  ;;  %v1624_v54 = vsel %vm1033_vm0, %v2230_v20, %v2234_v62  ;;  %v1750_v21 = vmax.f32 %v1238_v13, %v1622_v39  ;;  %v1751_v40 = vmax.f32 %v1239_v0, %v1623_v37 }
 0x14e   :  { %v1752_v8 = vmax.f32 %v1240_v18, %v1624_v54  ;;  %v1753_v25 = vmax.f32 %v1241_v19, %v1625_v63  ;;  %v3339_v3 = vadd.f32 %v2805_v55, %v533_v5  ;;  %v537_v62 = vmul.f32 %v2799_v51, %v415_v26 }
 0x14f   :  { %2452 = vrot.lane.b32.xlu2 %v2451_v23, %s2537_s2  ;;  %2462 = vrot.lane.b32.xlu0 %v2461_v34, %s2537_s2  ;;  %v1814_v38 = vmax.f32 %v1750_v21, %v2897_v56  ;;  %v1815_v50 = vmax.f32 %v1751_v40, %v2903_v59  ;;  %v2466_v23 = vpack.i.bf16 %v3261_v11, %v3878_v35  ;;  %v2250_v56 = vunpack.i.h.bf16 %v3269_v29  ;;  %v319_v21 = vpop.f32.mrf.mxu0 }
 0x150   :  { %v1816_v27 = vmax.f32 %v1752_v8, %v2900_v57  ;;  %2447 = vrot.lane.b32.xlu1 %v2446_v44, %s2537_s2  ;;  %v2249_v57 = vunpack.i.l.bf16 %v3269_v29  ;;  %v2456_v59 = vpack.i.bf16 %v3283_v10, %v3250_v61  ;;  %v3357_v18 = vadd.f32 %v2787_v43, %v535_v24 }
 0x151   :  { %v3342_v32 = vpop.permute.xlu2 %2277  ;;  %v3344_v30 = vpop.permute.xlu0 %2252  ;;  %v1872_v48 = vpack.c.bf16 %v1815_v50, %v1814_v38  ;;  %v3360_v60 = vadd.f32 %v2789_v45, %v536_v33  ;;  %v538_v29 = vmul.f32 %v2801_v52, %v464_v14  ;;  %v2471_v44 = vpack.i.bf16 %v3329_v1, %v3339_v3 }
 0x152   :  { %v1873_v2 = vpack.c.bf16 %v1753_v25, %v1816_v27  ;;  %v2238_v20 = vpop.permute.xlu1 %2237  ;;  %v2245_v34 = vunpack.i.h.bf16 %v3220_v7  ;;  %v2244_v63 = vunpack.i.l.bf16 %v3220_v7  ;;  %v1052_v39 = vsel %vm1033_vm0, %v2249_v57, %v2250_v56  ;;  %v368_v7 = vpop.f32.mrf.mxu1 }
 0x153   :  { %v2240_v5 = vunpack.i.h.bf16 %v2238_v20  ;;  %v2239_v13 = vunpack.i.l.bf16 %v2238_v20  ;;  %1904 = vst [vmem:[%s3812_s4 + $0x30] sm:$0xff] %v1872_v48  ;;  %v2275_v49 = vunpack.i.h.bf16 %v3304_v17  ;;  %v2274_v19 = vunpack.i.l.bf16 %v3304_v17  ;;  %v417_v17 = vpop.f32.mrf.mxu2  ;;  %v466_v24 = vpop.f32.mrf.mxu3 }
 0x154   :  { %1905 = vst [vmem:[%s3812_s4 + $0x38] sm:$0xff] %v1873_v2  ;;  %v3376_v37 = vadd.f32 %v2805_v55, %v537_v62  ;;  %v2476_v8 = vpack.i.bf16 %v3339_v3, %v3272_v36  ;;  %v3383_v26 = vadd.f32 %v2809_v58, %v538_v29  ;;  %v2486_v25 = vpack.i.bf16 %v3357_v18, %v3329_v1 }
 0x155   :  { %v1051_v54 = vsel %vm1033_vm0, %v2240_v5, %v2249_v57  ;;  %v1050_v0 = vsel %vm1033_vm0, %v2239_v13, %v2240_v5  ;;  %v1626_v38 = vsel %vm1033_vm0, %v2244_v63, %v2245_v34  ;;  %v1180_v27 = vmax.f32 %v2929_v15, %v1052_v39 }
 0x156   :  { %v1179_v14 = vmax.f32 %v2926_v12, %v1051_v54  ;;  %v1242_v40 = vmax.f32 %v1050_v0, %v2926_v12  ;;  %v2254_v33 = vunpack.i.l.bf16 %v3344_v30  ;;  %v1057_v12 = vsel %vm1033_vm0, %v2274_v19, %v2275_v49 }
 0x157   :  { %2457 = vrot.lane.b32.xlu2 %v2456_v59, %s2537_s2  ;;  %2467 = vrot.lane.b32.xlu0 %v2466_v23, %s2537_s2  ;;  %v3396_v23 = vmul.f32 %v2783_v41, %v319_v21  ;;  %v3400_v2 = vmul.f32 %v2785_v42, %v368_v7  ;;  %v2481_v20 = vpack.i.bf16 %v3357_v18, %v3878_v35  ;;  %v2280_v21 = vunpack.i.h.bf16 %v3342_v32 }
 0x158   :  { %2472 = vrot.lane.b32.xlu1 %v2471_v44, %s2537_s2  ;;  %v2491_v48 = vpack.i.bf16 %v3376_v37, %v3360_v60  ;;  %v1754_v44 = vmax.f32 %v1242_v40, %v1626_v38  ;;  %v541_v41 = vmul.f32 %v2799_v51, %v417_v17  ;;  %v542_v63 = vmul.f32 %v2801_v52, %v466_v24  ;;  %v3882_v24 = vld [vmem:[#allocation4_spill] sm:$0xff] }
 0x159   :  { %v3393_v50 = vpop.permute.xlu2 %2302  ;;  %v2258_v57 = vpop.permute.xlu0 %2257  ;;  %v1243_v54 = vmax.f32 %v1179_v14, %v2929_v15  ;;  %v1053_v42 = vsel %vm1033_vm0, %v2250_v56, %v2254_v33  ;;  %v1244_v0 = vmax.f32 %v1180_v27, %v2946_v28  ;;  %v1185_v49 = vmax.f32 %v2966_v46, %v1057_v12 }
 0x15a   :  { %v2263_v62 = vpop.permute.xlu1 %2262  ;;  %v2260_v5 = vunpack.i.h.bf16 %v2258_v57  ;;  %v2259_v13 = vunpack.i.l.bf16 %v2258_v57  ;;  %v2279_v51 = vunpack.i.l.bf16 %v3342_v32  ;;  %v2255_v52 = vunpack.i.h.bf16 %v3344_v30 }
 0x15b   :  { %v2265_v59 = vunpack.i.h.bf16 %v2263_v62  ;;  %v2264_v29 = vunpack.i.l.bf16 %v2263_v62  ;;  %v2496_v57 = vpack.i.bf16 -inf, %v3383_v26 }
 0x15c   :  { %v1627_v35 = vsel %vm1033_vm0, %v2245_v34, %v2259_v13  ;;  %v1628_v14 = vsel %vm1033_vm0, %v2259_v13, %v2260_v5  ;;  %v1181_v34 = vmax.f32 %v2946_v28, %v1053_v42  ;;  %v3883_v13 = vld [vmem:[#allocation5_spill] sm:$0xff] }
 0x15d   :  { %v1056_v39 = vsel %vm1033_vm0, %v2265_v59, %v2274_v19  ;;  %v1755_v7 = vmax.f32 %v1243_v54, %v1627_v35  ;;  %v1055_v40 = vsel %vm1033_vm0, %v2264_v29, %v2265_v59  ;;  %v1818_v19 = vmax.f32 %v1754_v44, %v2929_v15 }
 0x15e   :  { %v1183_v56 = vmax.f32 %v2949_v31, %v1055_v40  ;;  %v1184_v38 = vmax.f32 %v3882_v24, %v1056_v39  ;;  %v1054_v32 = vsel %vm1033_vm0, %v2255_v52, %v2264_v29  ;;  %v1756_v12 = vmax.f32 %v1244_v0, %v1628_v14  ;;  %v3884_v0 = vld [vmem:[#allocation3_spill] sm:$0xff] }
 0x15f   :  { %2482 = vrot.lane.b32.xlu2 %v2481_v20, %s2537_s2  ;;  %2492 = vrot.lane.b32.xlu0 %v2491_v48, %s2537_s2  ;;  %v1819_v17 = vmax.f32 %v1755_v7, %v2946_v28  ;;  %v1249_v15 = vmax.f32 %v1185_v49, %v3883_v13  ;;  %v1631_v28 = vsel %vm1033_vm0, %v2279_v51, %v2280_v21 }
 0x160   :  { %2477 = vrot.lane.b32.xlu1 %v2476_v8, %s2537_s2  ;;  %v1247_v30 = vmax.f32 %v1183_v56, %v3882_v24  ;;  %v1246_v29 = vmax.f32 %v1054_v32, %v2949_v31  ;;  %v1248_v35 = vmax.f32 %v1184_v38, %v2966_v46  ;;  %v1245_v39 = vmax.f32 %v1181_v34, %v3884_v0 }
 0x161   :  { %v3429_v27 = vpop.permute.xlu2 %2307  ;;  %v2283_v33 = vpop.permute.xlu0 %2282  ;;  %v1874_v62 = vpack.c.bf16 %v1819_v17, %v1818_v19  ;;  %v1820_v14 = vmax.f32 %v1756_v12, %v3884_v0  ;;  %v3456_v34 = vadd.f32 %v2787_v43, %v3396_v23  ;;  %v3460_v38 = vadd.f32 %v2789_v45, %v3400_v2 }
 0x162   :  { %v2285_v20 = vunpack.i.h.bf16 %v2283_v33  ;;  %v2268_v59 = vpop.permute.xlu1 %2267  ;;  %v2284_v44 = vunpack.i.l.bf16 %v2283_v33  ;;  %v1759_v42 = vmax.f32 %v1247_v30, %v1631_v28  ;;  %v2304_v12 = vunpack.i.l.bf16 %v3393_v50 }
 0x163   :  { %v2270_v54 = vunpack.i.h.bf16 %v2268_v59  ;;  %v2269_v8 = vunpack.i.l.bf16 %v2268_v59  ;;  %1906 = vst [vmem:[%s3812_s4 + $0x40] sm:$0xff] %v1874_v62  ;;  %v2511_v2 = vpack.i.bf16 %v3456_v34, %v3383_v26 }
 0x164   :  { %v1632_v7 = vsel %vm1033_vm0, %v2280_v21, %v2284_v44  ;;  %v1633_v49 = vsel %vm1033_vm0, %v2284_v44, %v2285_v20  ;;  %v2310_v44 = vunpack.i.h.bf16 %v3429_v27 }
 0x165   :  { %v1630_v40 = vsel %vm1033_vm0, %v2270_v54, %v2279_v51  ;;  %v1629_v52 = vsel %vm1033_vm0, %v2260_v5, %v2269_v8  ;;  %v1760_v56 = vmax.f32 %v1248_v35, %v1632_v7  ;;  %v1761_v33 = vmax.f32 %v1249_v15, %v1633_v49  ;;  %v3885_v54 = vld [vmem:[#allocation6_spill] sm:$0xff]  ;;  %v3886_v49 = vld [vmem:[#allocation7_spill] sm:$0xff] }
 0x166   :  { %v1757_v19 = vmax.f32 %v1245_v39, %v1629_v52  ;;  %v1758_v17 = vmax.f32 %v1246_v29, %v1630_v40  ;;  %v1823_v51 = vmax.f32 %v1759_v42, %v2966_v46  ;;  %v2309_v42 = vunpack.i.l.bf16 %v3429_v27 }
 0x167   :  { %2487 = vrot.lane.b32.xlu2 %v2486_v25, %s2537_s2  ;;  %2502 = vrot.lane.b32.xlu0 %v2491_v48, %s2537_s2  ;;  %v1824_v31 = vmax.f32 %v1760_v56, %v3883_v13  ;;  %v3463_v25 = vadd.f32 %v2805_v55, %v541_v41  ;;  %v3466_v48 = vadd.f32 %v2809_v58, %v542_v63  ;;  %v3887_v56 = vld [vmem:[#allocation11_spill] sm:$0xff] }
 0x168   :  { %v1822_v21 = vmax.f32 %v1758_v17, %v3882_v24  ;;  %v1875_v5 = vpack.c.bf16 %v1757_v19, %v1820_v14  ;;  %2497 = vrot.lane.b32.xlu1 %v2496_v57, %s2537_s2  ;;  %v2506_v58 = vpack.i.bf16 %v3460_v38, %v3456_v34 }
 0x169   :  { %v3468_v24 = vpop.permute.xlu2 %2332  ;;  %v2288_v46 = vpop.permute.xlu0 %2287  ;;  %v1877_v32 = vpack.c.bf16 %v1761_v33, %v1824_v31  ;;  %v2516_v23 = vpack.i.bf16 %v3466_v48, %v3463_v25  ;;  %v2521_v20 = vpack.i.bf16 %v3463_v25, %v3460_v38  ;;  %v2526_v29 = vpack.i.bf16 -inf, %v3466_v48 }
 0x16a   :  { %v1876_v30 = vpack.c.bf16 %v1823_v51, %v1822_v21  ;;  %1907 = vst [vmem:[%s3812_s4 + $0x48] sm:$0xff] %v1875_v5  ;;  %v2293_v43 = vpop.permute.xlu1 %2292  ;;  %v2290_v45 = vunpack.i.h.bf16 %v2288_v46  ;;  %v2289_v55 = vunpack.i.l.bf16 %v2288_v46  ;;  %v2538_v33 = vmov -inf|-inf  }
 0x16b   :  { %1909 = vst [vmem:[%s3812_s4 + $0x58] sm:$0xff] %v1877_v32  ;;  %v2295_v13 = vunpack.i.h.bf16 %v2293_v43  ;;  %v2294_v15 = vunpack.i.l.bf16 %v2293_v43  ;;  %v1636_v31 = vsel %vm1033_vm0, %v2309_v42, %v2310_v44 }
 0x16c   :  { %1908 = vst [vmem:[%s3812_s4 + $0x50] sm:$0xff] %v1876_v30  ;;  %v1058_v41 = vsel %vm1033_vm0, %v2289_v55, %v2290_v45 }
 0x16d   :  { %v1250_v8 = vmax.f32 %v1058_v41, %v3885_v54  ;;  %v1634_v52 = vsel %vm1033_vm0, %v2294_v15, %v2295_v13  ;;  %v1635_v21 = vsel %vm1033_vm0, %v2295_v13, %v2309_v42 }
 0x16f   :  { %2507 = vrot.lane.b32.xlu2 %v2506_v58, %s2537_s2  ;;  %2517 = vrot.lane.b32.xlu0 %v2516_v23, %s2537_s2  ;;  %v1762_v14 = vmax.f32 %v1250_v8, %v1634_v52  ;;  %v2305_v8 = vunpack.i.h.bf16 %v3393_v50 }
 0x170   :  { %2512 = vrot.lane.b32.xlu1 %v2511_v2, %s2537_s2 }
 0x171   :  { %v3489_v63 = vpop.permute.xlu2 %2337  ;;  %v2313_v57 = vpop.permute.xlu0 %2312  ;;  %v1826_v2 = vmax.f32 %v1762_v14, %v3886_v49  ;;  %v2335_v14 = vunpack.i.h.bf16 %v3468_v24 }
 0x172   :  { %v2298_v62 = vpop.permute.xlu1 %2297  ;;  %v2315_v51 = vunpack.i.h.bf16 %v2313_v57  ;;  %v2314_v5 = vunpack.i.l.bf16 %v2313_v57 }
 0x173   :  { %v2300_v59 = vunpack.i.h.bf16 %v2298_v62  ;;  %v2299_v28 = vunpack.i.l.bf16 %v2298_v62 }
 0x175   :  { %v1061_v35 = vsel %vm1033_vm0, %v2300_v59, %v2304_v12  ;;  %v1059_v0 = vsel %vm1033_vm0, %v2290_v45, %v2299_v28  ;;  %v1060_v39 = vsel %vm1033_vm0, %v2299_v28, %v2300_v59  ;;  %v3888_v12 = vld [vmem:[#allocation8_spill] sm:$0xff] }
 0x176   :  { %v1187_v7 = vmax.f32 %v3885_v54, %v1059_v0  ;;  %v1188_v40 = vmax.f32 %v3886_v49, %v1060_v39  ;;  %v1189_v19 = vmax.f32 %v3887_v56, %v1061_v35  ;;  %v3890_v35 = vld [vmem:[#allocation10_spill] sm:$0xff]  ;;  %v3891_v39 = vld [vmem:[#allocation13_spill] sm:$0xff] }
 0x177   :  { %2522 = vrot.lane.b32.xlu2 %v2521_v20, %s2537_s2  ;;  %2527 = vrot.lane.b32.xlu0 %v2526_v29, %s2537_s2  ;;  %v1063_v20 = vsel %vm1033_vm0, %v2314_v5, %v2315_v51  ;;  %v3889_v29 = vld [vmem:[#allocation9_spill] sm:$0xff] }
 0x178   :  { %v1251_v27 = vmax.f32 %v1187_v7, %v3886_v49  ;;  %v1252_v17 = vmax.f32 %v1188_v40, %v3887_v56  ;;  %2532 = vrot.lane.b32.xlu1 %v2538_v33, %s2537_s2  ;;  %v1253_v62 = vmax.f32 %v1189_v19, %v3888_v12  ;;  %v1191_v42 = vmax.f32 %v3889_v29, %v1063_v20 }
 0x179   :  { %v3512_v46 = vpop.permute.xlu2 %2362  ;;  %v2318_v32 = vpop.permute.xlu0 %2317  ;;  %v1062_v40 = vsel %vm1033_vm0, %v2305_v8, %v2314_v5 }
 0x17a   :  { %v1763_v30 = vmax.f32 %v1251_v27, %v1635_v21  ;;  %v1764_v43 = vmax.f32 %v1252_v17, %v1636_v31  ;;  %v2323_v45 = vpop.permute.xlu1 %2322  ;;  %v2319_v23 = vunpack.i.l.bf16 %v2318_v32  ;;  %v2320_v19 = vunpack.i.h.bf16 %v2318_v32  ;;  %v3892_v31 = vld [vmem:[#allocation12_spill] sm:$0xff] }
 0x17b   :  { %v2325_v55 = vunpack.i.h.bf16 %v2323_v45  ;;  %v2324_v58 = vunpack.i.l.bf16 %v2323_v45  ;;  %v1254_v33 = vmax.f32 %v1062_v40, %v3889_v29  ;;  %v3893_v40 = vld [vmem:[#allocation14_spill] sm:$0xff] }
 0x17c   :  { %v1827_v41 = vmax.f32 %v1763_v30, %v3887_v56  ;;  %v1637_v15 = vsel %vm1033_vm0, %v2310_v44, %v2319_v23  ;;  %v1828_v28 = vmax.f32 %v1764_v43, %v3888_v12  ;;  %v2334_v56 = vunpack.i.l.bf16 %v3468_v24 }
 0x17d   :  { %v1064_v13 = vsel %vm1033_vm0, %v2315_v51, %v2324_v58  ;;  %v1065_v57 = vsel %vm1033_vm0, %v2324_v58, %v2325_v55  ;;  %v1765_v54 = vmax.f32 %v1253_v62, %v1637_v15  ;;  %v1255_v51 = vmax.f32 %v1191_v42, %v3890_v35 }
 0x17e   :  { %v1878_v59 = vpack.c.bf16 %v1827_v41, %v1826_v2  ;;  %v1192_v0 = vmax.f32 %v3890_v35, %v1064_v13  ;;  %v1193_v7 = vmax.f32 %v3891_v39, %v1065_v57  ;;  %v1641_v32 = vsel %vm1033_vm0, %v2334_v56, %v2335_v14 }
 0x17f   :  { %v1879_v49 = vpack.c.bf16 %v1765_v54, %v1828_v28  ;;  %v2340_v13 = vunpack.i.h.bf16 %v3489_v63  ;;  %v2339_v57 = vunpack.i.l.bf16 %v3489_v63 }
 0x180   :  { %1910 = vst [vmem:[%s3812_s4 + $0x60] sm:$0xff] %v1878_v59  ;;  %v1257_v21 = vmax.f32 %v1193_v7, %v3892_v31  ;;  %v1256_v5 = vmax.f32 %v1192_v0, %v3891_v39 }
 0x181   :  { %v3530_v44 = vpop.permute.xlu2 %2367  ;;  %v2343_v52 = vpop.permute.xlu0 %2342  ;;  %1911 = vst [vmem:[%s3812_s4 + $0x68] sm:$0xff] %v1879_v49 }
 0x182   :  { %v2328_v50 = vpop.permute.xlu1 %2327  ;;  %v1769_v23 = vmax.f32 %v1257_v21, %v1641_v32  ;;  %v2345_v42 = vunpack.i.h.bf16 %v2343_v52  ;;  %v3895_v21 = vld [vmem:[#allocation17_spill] sm:$0xff] }
 0x183   :  { %v2330_v27 = vunpack.i.h.bf16 %v2328_v50  ;;  %v2329_v17 = vunpack.i.l.bf16 %v2328_v50  ;;  %v3894_v50 = vld [vmem:[#allocation15_spill] sm:$0xff] }
 0x185   :  { %v1640_v30 = vsel %vm1033_vm0, %v2330_v27, %v2334_v56  ;;  %v1638_v43 = vsel %vm1033_vm0, %v2320_v19, %v2329_v17  ;;  %v1639_v45 = vsel %vm1033_vm0, %v2329_v17, %v2330_v27  ;;  %v2365_v19 = vunpack.i.h.bf16 %v3512_v46 }
 0x186   :  { %v1766_v55 = vmax.f32 %v1254_v33, %v1638_v43  ;;  %v1767_v58 = vmax.f32 %v1255_v51, %v1639_v45  ;;  %v1768_v24 = vmax.f32 %v1256_v5, %v1640_v30  ;;  %v2364_v33 = vunpack.i.l.bf16 %v3512_v46 }
 0x188   :  { %v1830_v2 = vmax.f32 %v1766_v55, %v3890_v35  ;;  %v1831_v41 = vmax.f32 %v1767_v58, %v3891_v39  ;;  %v1832_v12 = vmax.f32 %v1768_v24, %v3892_v31  ;;  %v2344_v35 = vunpack.i.l.bf16 %v2343_v52 }
 0x189   :  { %v3548_v62 = vpop.permute.xlu2 %2392  ;;  %v2348_v20 = vpop.permute.xlu0 %2347  ;;  %v1066_v39 = vsel %vm1033_vm0, %v2339_v57, %v2340_v13  ;;  %v2369_v31 = vunpack.i.l.bf16 %v3530_v44 }
 0x18a   :  { %v1880_v15 = vpack.c.bf16 %v1831_v41, %v1830_v2  ;;  %v1881_v59 = vpack.c.bf16 %v1769_v23, %v1832_v12  ;;  %v2353_v28 = vpop.permute.xlu1 %2352  ;;  %v2350_v8 = vunpack.i.h.bf16 %v2348_v20  ;;  %v2349_v29 = vunpack.i.l.bf16 %v2348_v20 }
 0x18b   :  { %v2354_v54 = vunpack.i.l.bf16 %v2353_v28  ;;  %v1642_v49 = vsel %vm1033_vm0, %v2344_v35, %v2345_v42  ;;  %v1258_v52 = vmax.f32 %v1066_v39, %v3893_v40  ;;  %v2355_v24 = vunpack.i.h.bf16 %v2353_v28  ;;  %v3897_v35 = vld [vmem:[#allocation19_spill] sm:$0xff] }
 0x18c   :  { %1912 = vst [vmem:[%s3812_s4 + $0x70] sm:$0xff] %v1880_v15  ;;  %v1067_v0 = vsel %vm1033_vm0, %v2340_v13, %v2349_v29  ;;  %v1068_v63 = vsel %vm1033_vm0, %v2349_v29, %v2350_v8  ;;  %v1071_v20 = vsel %vm1033_vm0, %v2364_v33, %v2365_v19  ;;  %v3896_v13 = vld [vmem:[#allocation16_spill] sm:$0xff] }
 0x18d   :  { %1913 = vst [vmem:[%s3812_s4 + $0x78] sm:$0xff] %v1881_v59  ;;  %v1069_v7 = vsel %vm1033_vm0, %v2350_v8, %v2354_v54  ;;  %v1195_v14 = vmax.f32 %v3893_v40, %v1067_v0  ;;  %v1196_v56 = vmax.f32 %v3894_v50, %v1068_v63  ;;  %v1770_v43 = vmax.f32 %v1258_v52, %v1642_v49  ;;  %v3898_v63 = vld [vmem:[#allocation18_spill] sm:$0xff]  ;;  %v3899_v52 = vld [vmem:[#allocation21_spill] sm:$0xff] }
 0x18e   :  { %v1197_v51 = vmax.f32 %v3895_v21, %v1069_v7  ;;  %v1199_v39 = vmax.f32 %v3898_v63, %v1071_v20  ;;  %v1070_v7 = vsel %vm1033_vm0, %v2355_v24, %v2364_v33 }
 0x18f   :  { %v1259_v32 = vmax.f32 %v1195_v14, %v3894_v50  ;;  %v1260_v23 = vmax.f32 %v1196_v56, %v3895_v21  ;;  %v1834_v28 = vmax.f32 %v1770_v43, %v3894_v50  ;;  %v2370_v14 = vunpack.i.h.bf16 %v3530_v44 }
 0x190   :  { %v1261_v57 = vmax.f32 %v1197_v51, %v3896_v13 }
 0x191   :  { %v3567_v27 = vpop.permute.xlu2 %2397  ;;  %v2373_v17 = vpop.permute.xlu0 %2372 }
 0x192   :  { %v2358_v5 = vpop.permute.xlu1 %2357  ;;  %v2374_v30 = vunpack.i.l.bf16 %v2373_v17  ;;  %v2375_v58 = vunpack.i.h.bf16 %v2373_v17 }
 0x193   :  { %v2360_v45 = vunpack.i.h.bf16 %v2358_v5  ;;  %v2359_v55 = vunpack.i.l.bf16 %v2358_v5 }
 0x194   :  { %v1072_v12 = vsel %vm1033_vm0, %v2365_v19, %v2374_v30  ;;  %v1073_v54 = vsel %vm1033_vm0, %v2374_v30, %v2375_v58  ;;  %v1262_v30 = vmax.f32 %v1070_v7, %v3898_v63  ;;  %v3900_v58 = vld [vmem:[#allocation20_spill] sm:$0xff] }
 0x195   :  { %v1643_v2 = vsel %vm1033_vm0, %v2345_v42, %v2359_v55  ;;  %v1644_v41 = vsel %vm1033_vm0, %v2359_v55, %v2360_v45  ;;  %v1645_v46 = vsel %vm1033_vm0, %v2360_v45, %v2369_v31  ;;  %v1200_v0 = vmax.f32 %v3897_v35, %v1072_v12 }
 0x196   :  { %v1771_v15 = vmax.f32 %v1259_v32, %v1643_v2  ;;  %v1772_v59 = vmax.f32 %v1260_v23, %v1644_v41  ;;  %v1773_v8 = vmax.f32 %v1261_v57, %v1645_v46  ;;  %v1201_v19 = vmax.f32 %v3899_v52, %v1073_v54 }
 0x197   :  { %v1264_v33 = vmax.f32 %v1200_v0, %v3899_v52  ;;  %v1263_v45 = vmax.f32 %v1199_v39, %v3897_v35 }
 0x198   :  { %v1835_v29 = vmax.f32 %v1771_v15, %v3895_v21  ;;  %v1836_v42 = vmax.f32 %v1772_v59, %v3896_v13  ;;  %v1265_v24 = vmax.f32 %v1201_v19, %v3900_v58  ;;  %v2400_v59 = vunpack.i.h.bf16 %v3567_v27 }
 0x199   :  { %v3587_v49 = vpop.permute.xlu2 %2422  ;;  %v2378_v40 = vpop.permute.xlu0 %2377 }
 0x19a   :  { %v1882_v56 = vpack.c.bf16 %v1835_v29, %v1834_v28  ;;  %v1883_v50 = vpack.c.bf16 %v1773_v8, %v1836_v42  ;;  %v2383_v17 = vpop.permute.xlu1 %2382  ;;  %v2380_v51 = vunpack.i.h.bf16 %v2378_v40  ;;  %v2379_v5 = vunpack.i.l.bf16 %v2378_v40 }
 0x19b   :  { %v2385_v31 = vunpack.i.h.bf16 %v2383_v17  ;;  %v2384_v21 = vunpack.i.l.bf16 %v2383_v17  ;;  %v2399_v28 = vunpack.i.l.bf16 %v3567_v27  ;;  %v2394_v27 = vunpack.i.l.bf16 %v3548_v62 }
 0x19c   :  { %1914 = vst [vmem:[%s3812_s4 + $0x80] sm:$0xff] %v1882_v56  ;;  %v1646_v55 = vsel %vm1033_vm0, %v2370_v14, %v2379_v5  ;;  %v1647_v32 = vsel %vm1033_vm0, %v2379_v5, %v2380_v51  ;;  %v2425_v40 = vunpack.i.h.bf16 %v3587_v49  ;;  %v2424_v14 = vunpack.i.l.bf16 %v3587_v49 }
 0x19d   :  { %1915 = vst [vmem:[%s3812_s4 + $0x88] sm:$0xff] %v1883_v50  ;;  %v1649_v44 = vsel %vm1033_vm0, %v2384_v21, %v2385_v31  ;;  %v1648_v43 = vsel %vm1033_vm0, %v2380_v51, %v2384_v21  ;;  %v1774_v23 = vmax.f32 %v1262_v30, %v1646_v55  ;;  %v1775_v41 = vmax.f32 %v1263_v45, %v1647_v32 }
 0x19e   :  { %v1776_v2 = vmax.f32 %v1264_v33, %v1648_v43  ;;  %v1777_v46 = vmax.f32 %v1265_v24, %v1649_v44  ;;  %v1076_v7 = vsel %vm1033_vm0, %v2399_v28, %v2400_v59 }
 0x19f   :  { %v1838_v12 = vmax.f32 %v1774_v23, %v3897_v35  ;;  %v1839_v13 = vmax.f32 %v1775_v41, %v3899_v52  ;;  %v2395_v35 = vunpack.i.h.bf16 %v3548_v62  ;;  %v1204_v52 = vmax.f32 %v3126_v4, %v1076_v7 }
 0x1a0   :  { %v1840_v20 = vmax.f32 %v1776_v2, %v3900_v58  ;;  %v1081_v62 = vsel %vm1033_vm0, %v2424_v14, %v2425_v40 }
 0x1a1   :  { %v3608_v57 = vpop.permute.xlu2 %2427  ;;  %v2403_v15 = vpop.permute.xlu0 %2402  ;;  %v1884_v29 = vpack.c.bf16 %v1839_v13, %v1838_v12  ;;  %v1650_v21 = vsel %vm1033_vm0, %v2394_v27, %v2395_v35  ;;  %v1268_v45 = vmax.f32 %v1204_v52, %v3141_v22  ;;  %v1209_v24 = vmax.f32 %v3178_v9, %v1081_v62  ;;  %v3902_v52 = vld [vmem:[#allocation22_spill] sm:$0xff] }
 0x1a2   :  { %v1885_v54 = vpack.c.bf16 %v1777_v46, %v1840_v20  ;;  %v2388_v8 = vpop.permute.xlu1 %2387  ;;  %v2404_v19 = vunpack.i.l.bf16 %v2403_v15  ;;  %v2430_v32 = vunpack.i.h.bf16 %v3608_v57  ;;  %v2429_v41 = vunpack.i.l.bf16 %v3608_v57 }
 0x1a3   :  { %v2390_v42 = vunpack.i.h.bf16 %v2388_v8  ;;  %v2389_v0 = vunpack.i.l.bf16 %v2388_v8  ;;  %1916 = vst [vmem:[%s3812_s4 + $0x90] sm:$0xff] %v1884_v29  ;;  %v2405_v46 = vunpack.i.h.bf16 %v2403_v15 }
 0x1a4   :  { %1917 = vst [vmem:[%s3812_s4 + $0x98] sm:$0xff] %v1885_v54  ;;  %v1655_v7 = vsel %vm1033_vm0, %v2429_v41, %v2430_v32 }
 0x1a5   :  { %v1075_v63 = vsel %vm1033_vm0, %v2390_v42, %v2399_v28  ;;  %v1074_v39 = vsel %vm1033_vm0, %v2389_v0, %v2390_v42 }
 0x1a6   :  { %v1203_v56 = vmax.f32 %v3123_v53, %v1075_v63  ;;  %v1266_v50 = vmax.f32 %v1074_v39, %v3123_v53  ;;  %v1077_v53 = vsel %vm1033_vm0, %v2400_v59, %v2404_v19  ;;  %v3901_v63 = vld [vmem:[#allocation23_spill] sm:$0xff] }
 0x1a7   :  { %v1205_v13 = vmax.f32 %v3141_v22, %v1077_v53  ;;  %v1273_v39 = vmax.f32 %v1209_v24, %v3901_v63 }
 0x1a8   :  { %v1778_v49 = vmax.f32 %v1266_v50, %v1650_v21  ;;  %v1267_v43 = vmax.f32 %v1203_v56, %v3126_v4 }
 0x1a9   :  { %v3628_v17 = vpop.permute.xlu2 %2452  ;;  %v2408_v31 = vpop.permute.xlu0 %2407  ;;  %v1269_v19 = vmax.f32 %v1205_v13, %v3902_v52 }
 0x1aa   :  { %v2413_v51 = vpop.permute.xlu1 %2412  ;;  %v2410_v5 = vunpack.i.h.bf16 %v2408_v31  ;;  %v2409_v30 = vunpack.i.l.bf16 %v2408_v31  ;;  %v1842_v59 = vmax.f32 %v1778_v49, %v3126_v4 }
 0x1ab   :  { %v2415_v33 = vunpack.i.h.bf16 %v2413_v51  ;;  %v2414_v44 = vunpack.i.l.bf16 %v2413_v51 }
 0x1ac   :  { %v1651_v55 = vsel %vm1033_vm0, %v2395_v35, %v2409_v30  ;;  %v1652_v12 = vsel %vm1033_vm0, %v2409_v30, %v2410_v5 }
 0x1ad   :  { %v1080_v58 = vsel %vm1033_vm0, %v2415_v33, %v2424_v14  ;;  %v1779_v23 = vmax.f32 %v1267_v43, %v1651_v55  ;;  %v1079_v2 = vsel %vm1033_vm0, %v2414_v44, %v2415_v33  ;;  %v1078_v8 = vsel %vm1033_vm0, %v2405_v46, %v2414_v44 }
 0x1ae   :  { %v1207_v20 = vmax.f32 %v3192_v47, %v1079_v2  ;;  %v1208_v54 = vmax.f32 %v3195_v6, %v1080_v58  ;;  %v1780_v15 = vmax.f32 %v1268_v45, %v1652_v12  ;;  %v1270_v14 = vmax.f32 %v1078_v8, %v3192_v47  ;;  %v3903_v8 = vld [vmem:[#allocation24_spill] sm:$0xff] }
 0x1af   :  { %v1843_v28 = vmax.f32 %v1779_v23, %v3141_v22  ;;  %v2454_v46 = vunpack.i.l.bf16 %v3628_v17 }
 0x1b0   :  { %v1271_v29 = vmax.f32 %v1207_v20, %v3195_v6  ;;  %v1272_v50 = vmax.f32 %v1208_v54, %v3178_v9  ;;  %v1844_v30 = vmax.f32 %v1780_v15, %v3902_v52 }
 0x1b1   :  { %v3649_v42 = vpop.permute.xlu2 %2457  ;;  %v2433_v57 = vpop.permute.xlu0 %2432  ;;  %v1886_v0 = vpack.c.bf16 %v1843_v28, %v1842_v59 }
 0x1b2   :  { %v2435_v35 = vunpack.i.h.bf16 %v2433_v57  ;;  %v2418_v27 = vpop.permute.xlu1 %2417  ;;  %v2434_v4 = vunpack.i.l.bf16 %v2433_v57  ;;  %v1783_v56 = vmax.f32 %v1271_v29, %v1655_v7  ;;  %v2460_v54 = vunpack.i.h.bf16 %v3649_v42 }
 0x1b3   :  { %v2420_v40 = vunpack.i.h.bf16 %v2418_v27  ;;  %v2419_v22 = vunpack.i.l.bf16 %v2418_v27  ;;  %1918 = vst [vmem:[%s3812_s4 + $0xa0] sm:$0xff] %v1886_v0  ;;  %v2459_v57 = vunpack.i.l.bf16 %v3649_v42 }
 0x1b4   :  { %v1656_v31 = vsel %vm1033_vm0, %v2430_v32, %v2434_v4  ;;  %v1657_v21 = vsel %vm1033_vm0, %v2434_v4, %v2435_v35  ;;  %v1847_v45 = vmax.f32 %v1783_v56, %v3178_v9 }
 0x1b5   :  { %v1654_v62 = vsel %vm1033_vm0, %v2420_v40, %v2429_v41  ;;  %v1653_v51 = vsel %vm1033_vm0, %v2410_v5, %v2419_v22  ;;  %v1784_v33 = vmax.f32 %v1272_v50, %v1656_v31  ;;  %v1785_v43 = vmax.f32 %v1273_v39, %v1657_v21 }
 0x1b6   :  { %v1781_v44 = vmax.f32 %v1269_v19, %v1653_v51  ;;  %v1782_v49 = vmax.f32 %v1270_v14, %v1654_v62  ;;  %v1660_v14 = vsel %vm1033_vm0, %v2459_v57, %v2460_v54 }
 0x1b7   :  { %v1848_v47 = vmax.f32 %v1784_v33, %v3901_v63 }
 0x1b8   :  { %v1846_v53 = vmax.f32 %v1782_v49, %v3195_v6  ;;  %v1887_v55 = vpack.c.bf16 %v1781_v44, %v1844_v30 }
 0x1b9   :  { %v2438_v58 = vpop.permute.xlu0 %2437  ;;  %v1889_v24 = vpack.c.bf16 %v1785_v43, %v1848_v47  ;;  %v3670_v23 = vpop.permute.xlu2 %2482  ;;  %v2455_v47 = vunpack.i.h.bf16 %v3628_v17 }
 0x1ba   :  { %v1888_v32 = vpack.c.bf16 %v1847_v45, %v1846_v53  ;;  %1919 = vst [vmem:[%s3812_s4 + $0xa8] sm:$0xff] %v1887_v55  ;;  %v2443_v5 = vpop.permute.xlu1 %2442  ;;  %v2440_v9 = vunpack.i.h.bf16 %v2438_v58  ;;  %v2439_v6 = vunpack.i.l.bf16 %v2438_v58  ;;  %v2484_v17 = vunpack.i.l.bf16 %v3670_v23 }
 0x1bb   :  { %1921 = vst [vmem:[%s3812_s4 + $0xb8] sm:$0xff] %v1889_v24  ;;  %v2445_v20 = vunpack.i.h.bf16 %v2443_v5  ;;  %v2444_v13 = vunpack.i.l.bf16 %v2443_v5  ;;  %v2485_v5 = vunpack.i.h.bf16 %v3670_v23 }
 0x1bc   :  { %1920 = vst [vmem:[%s3812_s4 + $0xb0] sm:$0xff] %v1888_v32  ;;  %v1082_v2 = vsel %vm1033_vm0, %v2439_v6, %v2440_v9 }
 0x1bd   :  { %v1274_v29 = vmax.f32 %v1082_v2, %v3903_v8  ;;  %v1658_v7 = vsel %vm1033_vm0, %v2444_v13, %v2445_v20  ;;  %v1659_v56 = vsel %vm1033_vm0, %v2445_v20, %v2459_v57 }
 0x1bf   :  { %v1786_v4 = vmax.f32 %v1274_v29, %v1658_v7 }
 0x1c1   :  { %v3679_v41 = vpop.permute.xlu0 %2462  ;;  %v3685_v15 = vpop.permute.xlu2 %2487  ;;  %v1850_v30 = vmax.f32 %v1786_v4, %v3244_v16 }
 0x1c2   :  { %v2448_v12 = vpop.permute.xlu1 %2447  ;;  %v2465_v50 = vunpack.i.h.bf16 %v3679_v41  ;;  %v2464_v52 = vunpack.i.l.bf16 %v3679_v41  ;;  %v2490_v4 = vunpack.i.h.bf16 %v3685_v15 }
 0x1c3   :  { %v2450_v59 = vunpack.i.h.bf16 %v2448_v12  ;;  %v2449_v28 = vunpack.i.l.bf16 %v2448_v12 }
 0x1c4   :  { %v1087_v49 = vsel %vm1033_vm0, %v2464_v52, %v2465_v50 }
 0x1c5   :  { %v1085_v0 = vsel %vm1033_vm0, %v2450_v59, %v2454_v46  ;;  %v1083_v35 = vsel %vm1033_vm0, %v2440_v9, %v2449_v28  ;;  %v1084_v63 = vsel %vm1033_vm0, %v2449_v28, %v2450_v59 }
 0x1c6   :  { %v1211_v39 = vmax.f32 %v3903_v8, %v1083_v35  ;;  %v1212_v27 = vmax.f32 %v3244_v16, %v1084_v63  ;;  %v1213_v40 = vmax.f32 %v3250_v61, %v1085_v0 }
 0x1c8   :  { %v1275_v22 = vmax.f32 %v1211_v39, %v3244_v16  ;;  %v1276_v42 = vmax.f32 %v1212_v27, %v3250_v61  ;;  %v1277_v44 = vmax.f32 %v1213_v40, %v3283_v10  ;;  %v1086_v16 = vsel %vm1033_vm0, %v2455_v47, %v2464_v52 }
 0x1c9   :  { %v2468_v19 = vpop.permute.xlu0 %2467  ;;  %v3709_v58 = vpop.permute.xlu2 %2507  ;;  %v1278_v6 = vmax.f32 %v1086_v16, %v3261_v11 }
 0x1ca   :  { %v1787_v31 = vmax.f32 %v1275_v22, %v1659_v56  ;;  %v1788_v21 = vmax.f32 %v1276_v42, %v1660_v14  ;;  %v3700_v62 = vpop.permute.xlu1 %2472  ;;  %v2469_v51 = vunpack.i.l.bf16 %v2468_v19  ;;  %v2470_v2 = vunpack.i.h.bf16 %v2468_v19 }
 0x1cb   :  { %v2510_v12 = vunpack.i.h.bf16 %v3709_v58  ;;  %v2509_v20 = vunpack.i.l.bf16 %v3709_v58  ;;  %v2474_v29 = vunpack.i.l.bf16 %v3700_v62  ;;  %v2475_v52 = vunpack.i.h.bf16 %v3700_v62 }
 0x1cc   :  { %v1851_v33 = vmax.f32 %v1787_v31, %v3250_v61  ;;  %v1661_v43 = vsel %vm1033_vm0, %v2460_v54, %v2469_v51  ;;  %v1852_v45 = vmax.f32 %v1788_v21, %v3283_v10  ;;  %v1215_v61 = vmax.f32 %v3261_v11, %v1087_v49 }
 0x1cd   :  { %v1789_v55 = vmax.f32 %v1277_v44, %v1661_v43  ;;  %v1090_v54 = vsel %vm1033_vm0, %v2484_v17, %v2485_v5  ;;  %v1095_v0 = vsel %vm1033_vm0, %v2509_v20, %v2510_v12  ;;  %v1088_v19 = vsel %vm1033_vm0, %v2465_v50, %v2474_v29 }
 0x1ce   :  { %v1890_v53 = vpack.c.bf16 %v1851_v33, %v1850_v30  ;;  %v1279_v23 = vmax.f32 %v1215_v61, %v3272_v36  ;;  %v1282_v39 = vmax.f32 %v1090_v54, %v3357_v18  ;;  %v1223_v56 = vmax.f32 %v3456_v34, %v1095_v0 }
 0x1cf   :  { %v1891_v24 = vpack.c.bf16 %v1789_v55, %v1852_v45  ;;  %v1089_v47 = vsel %vm1033_vm0, %v2474_v29, %v2475_v52 }
 0x1d0   :  { %1922 = vst [vmem:[%s3812_s4 + $0xc0] sm:$0xff] %v1890_v53  ;;  %v1216_v53 = vmax.f32 %v3272_v36, %v1088_v19  ;;  %v1287_v45 = vmax.f32 %v1223_v56, %v3460_v38 }
 0x1d1   :  { %v3716_v32 = vpop.permute.xlu0 %2492  ;;  %1923 = vst [vmem:[%s3812_s4 + $0xc8] sm:$0xff] %v1891_v24  ;;  %v3742_v27 = vpop.permute.xlu2 %2522 }
 0x1d2   :  { %v3723_v10 = vpop.permute.xlu1 %2477  ;;  %v2494_v9 = vunpack.i.l.bf16 %v3716_v32  ;;  %v2525_v21 = vunpack.i.h.bf16 %v3742_v27  ;;  %v2495_v33 = vunpack.i.h.bf16 %v3716_v32 }
 0x1d3   :  { %v2480_v41 = vunpack.i.h.bf16 %v3723_v10  ;;  %v2479_v46 = vunpack.i.l.bf16 %v3723_v10 }
 0x1d4   :  { %v1091_v13 = vsel %vm1033_vm0, %v2485_v5, %v2494_v9  ;;  %v1092_v58 = vsel %vm1033_vm0, %v2494_v9, %v2495_v33  ;;  %v2489_v5 = vunpack.i.l.bf16 %v3685_v15 }
 0x1d5   :  { %v1662_v59 = vsel %vm1033_vm0, %v2470_v2, %v2479_v46  ;;  %v1663_v28 = vsel %vm1033_vm0, %v2479_v46, %v2480_v41  ;;  %v1219_v57 = vmax.f32 %v3357_v18, %v1091_v13  ;;  %v2524_v18 = vunpack.i.l.bf16 %v3742_v27 }
 0x1d6   :  { %v1790_v11 = vmax.f32 %v1278_v6, %v1662_v59  ;;  %v1791_v8 = vmax.f32 %v1279_v23, %v1663_v28  ;;  %v1217_v2 = vmax.f32 %v3339_v3, %v1089_v47  ;;  %v1664_v9 = vsel %vm1033_vm0, %v2480_v41, %v2489_v5 }
 0x1d7   :  { %v1283_v31 = vmax.f32 %v1219_v57, %v3360_v60  ;;  %v1671_v55 = vsel %vm1033_vm0, %v2524_v18, %v2525_v21  ;;  %v1280_v59 = vmax.f32 %v1216_v53, %v3339_v3 }
 0x1d8   :  { %v1854_v35 = vmax.f32 %v1790_v11, %v3272_v36  ;;  %v1855_v63 = vmax.f32 %v1791_v8, %v3339_v3  ;;  %v1799_v46 = vmax.f32 %v1287_v45, %v1671_v55 }
 0x1d9   :  { %v2503_v7 = vpop.permute.xlu0 %2502  ;;  %v1792_v57 = vmax.f32 %v1280_v59, %v1664_v9 }
 0x1da   :  { %v1892_v40 = vpack.c.bf16 %v1855_v63, %v1854_v35  ;;  %v2498_v22 = vpop.permute.xlu1 %2497  ;;  %v2505_v42 = vunpack.i.h.bf16 %v2503_v7  ;;  %v2504_v14 = vunpack.i.l.bf16 %v2503_v7  ;;  %v1863_v29 = vmax.f32 %v1799_v46, %v3463_v25 }
 0x1db   :  { %v2500_v44 = vunpack.i.h.bf16 %v2498_v22  ;;  %v2499_v16 = vunpack.i.l.bf16 %v2498_v22  ;;  %v1281_v35 = vmax.f32 %v1217_v2, %v3329_v1  ;;  %v1856_v22 = vmax.f32 %v1792_v57, %v3329_v1 }
 0x1dc   :  { %1924 = vst [vmem:[%s3812_s4 + $0xd0] sm:$0xff] %v1892_v40  ;;  %v1666_v51 = vsel %vm1033_vm0, %v2490_v4, %v2504_v14  ;;  %v1667_v30 = vsel %vm1033_vm0, %v2504_v14, %v2505_v42 }
 0x1dd   :  { %v1794_v62 = vmax.f32 %v1282_v39, %v1666_v51  ;;  %v1795_v49 = vmax.f32 %v1283_v31, %v1667_v30  ;;  %v1094_v61 = vsel %vm1033_vm0, %v2500_v44, %v2509_v20  ;;  %v1220_v20 = vmax.f32 %v3360_v60, %v1092_v58 }
 0x1de   :  { %v1286_v13 = vmax.f32 %v1094_v61, %v3456_v34  ;;  %v1093_v28 = vsel %vm1033_vm0, %v2495_v33, %v2499_v16 }
 0x1df   :  { %v1858_v50 = vmax.f32 %v1794_v62, %v3360_v60  ;;  %v1859_v43 = vmax.f32 %v1795_v49, %v3376_v37  ;;  %v1221_v34 = vmax.f32 %v3376_v37, %v1093_v28  ;;  %v1284_v3 = vmax.f32 %v1220_v20, %v3376_v37 }
 0x1e1   :  { %v1894_v24 = vpack.c.bf16 %v1859_v43, %v1858_v50  ;;  %v2518_v32 = vpop.permute.xlu0 %2517  ;;  %v1285_v52 = vmax.f32 %v1221_v34, %v3383_v26 }
 0x1e2   :  { %v2520_v17 = vunpack.i.h.bf16 %v2518_v32  ;;  %v2519_v10 = vunpack.i.l.bf16 %v2518_v32  ;;  %v2513_v6 = vpop.permute.xlu1 %2512 }
 0x1e3   :  { %1926 = vst [vmem:[%s3812_s4 + $0xe0] sm:$0xff] %v1894_v24  ;;  %v2515_v36 = vunpack.i.h.bf16 %v2513_v6  ;;  %v2514_v23 = vunpack.i.l.bf16 %v2513_v6 }
 0x1e4   :  { %v1096_v15 = vsel %vm1033_vm0, %v2510_v12, %v2519_v10  ;;  %v1097_v54 = vsel %vm1033_vm0, %v2519_v10, %v2520_v17 }
 0x1e5   :  { %v1670_v11 = vsel %vm1033_vm0, %v2515_v36, %v2524_v18  ;;  %v1224_v41 = vmax.f32 %v3460_v38, %v1096_v15  ;;  %v1668_v60 = vsel %vm1033_vm0, %v2505_v42, %v2514_v23  ;;  %v1225_v12 = vmax.f32 %v3463_v25, %v1097_v54 }
 0x1e6   :  { %v1798_v8 = vmax.f32 %v1286_v13, %v1670_v11  ;;  %v1796_v39 = vmax.f32 %v1284_v3, %v1668_v60 }
 0x1e7   :  { %v1288_v42 = vmax.f32 %v1224_v41, %v3463_v25  ;;  %v1289_v19 = vmax.f32 %v1225_v12, %v3466_v48 }
 0x1e8   :  { %v1862_v0 = vmax.f32 %v1798_v8, %v3460_v38  ;;  %v1860_v51 = vmax.f32 %v1796_v39, %v3383_v26 }
 0x1e9   :  { %v2528_v63 = vpop.permute.xlu0 %2527 }
 0x1ea   :  { %v1896_v27 = vpack.c.bf16 %v1863_v29, %v1862_v0  ;;  %v2530_v7 = vunpack.i.h.bf16 %v2528_v63  ;;  %v2529_v4 = vunpack.i.l.bf16 %v2528_v63  ;;  %v2533_v40 = vpop.permute.xlu1 %2532 }
 0x1eb   :  { %v2535_v14 = vunpack.i.h.bf16 %v2533_v40  ;;  %v2534_v56 = vunpack.i.l.bf16 %v2533_v40 }
 0x1ec   :  { %1928 = vst [vmem:[%s3812_s4 + $0xf0] sm:$0xff] %v1896_v27  ;;  %v1665_v37 = vsel %vm1033_vm0, %v2489_v5, %v2530_v7  ;;  %v1672_v38 = vsel %vm1033_vm0, %v2525_v21, %v2529_v4 }
 0x1ed   :  { %v1793_v31 = vmax.f32 %v1281_v35, %v1665_v37  ;;  %v1800_v18 = vmax.f32 %v1288_v42, %v1672_v38  ;;  %v1673_v1 = vsel %vm1033_vm0, %v2529_v4, %v2535_v14  ;;  %v1669_v25 = vsel %vm1033_vm0, %v2514_v23, %v2534_v56 }
 0x1ee   :  { %v1797_v30 = vmax.f32 %v1285_v52, %v1669_v25  ;;  %v1801_v62 = vmax.f32 %v1289_v19, %v1673_v1 }
 0x1ef   :  { %v1864_v33 = vmax.f32 %v1800_v18, %v3466_v48  ;;  %v1893_v44 = vpack.c.bf16 %v1793_v31, %v1856_v22 }
 0x1f0   :  { %v1895_v49 = vpack.c.bf16 %v1797_v30, %v1860_v51 }
 0x1f1   :  { %1925 = vst [vmem:[%s3812_s4 + $0xd8] sm:$0xff] %v1893_v44  ;;  %v1897_v21 = vpack.c.bf16 %v1801_v62, %v1864_v33 }
 0x1f2   :  { %1927 = vst [vmem:[%s3812_s4 + $0xe8] sm:$0xff] %v1895_v49 }
 0x1f3   :  { %1929 = vst [vmem:[%s3812_s4 + $0xf8] sm:$0xff] %v1897_v21 }

</bundles_post_ra>
